<compile_context>
chip_gen: v7x
topology: tpu7x:2x2x1
jax: 0.10.0
libtpu: 0.0.40
codegen_flags: <defaults>
</compile_context>

<pallas_src>
import jax
import jax.numpy as jnp
from jax.experimental import pallas as pl
from jax.experimental.pallas import tpu as pltpu

# MXU operand dtype (bf16 on-chip matmuls, f32 accumulation).
MXU_DTYPE = jnp.bfloat16


# ----------------------------------------------------------------------------
# Fused per-batch-element forward kernel (one grid step == one batch element)
# ----------------------------------------------------------------------------

def _build_dgn_kernel(*, A, num_heads, kv, hidden, n_enc, n_att, n_q):
    HK = num_heads * kv
    scale = 1.0 / (kv ** 0.5)

    def mm(x_f32, w_ref, b_ref, relu):
        # MXU matmul: bf16 operands, f32 accumulation; bias + ReLU in f32 (VPU).
        y = jnp.dot(x_f32.astype(w_ref.dtype), w_ref[...],
                    preferred_element_type=jnp.float32)
        y = y + b_ref[...]
        if relu:
            y = jnp.maximum(y, 0.0)
        return y

    def kernel(*refs):
        # ---- unpack refs: [x, mask, enc(W,b)*, att(Wvqk,bvqk,Wo,bo)*,
        #                    qnet(W,b)*, q_out, aw_out*, head_scratch] ----
        x_ref, mask_ref = refs[0], refs[1]
        pos = 2
        enc = [(refs[pos + 2 * i], refs[pos + 2 * i + 1]) for i in range(n_enc)]
        pos += 2 * n_enc
        att = [tuple(refs[pos + 4 * i + j] for j in range(4)) for i in range(n_att)]
        pos += 4 * n_att
        qnet = [(refs[pos + 2 * i], refs[pos + 2 * i + 1]) for i in range(n_q)]
        pos += 2 * n_q
        q_ref = refs[pos]
        aw_refs = refs[pos + 1: pos + 1 + n_att]
        head_scratch = refs[pos + 1 + n_att]          # VMEM (A, HK) f32

        # ---- mask bias, hoisted out of the layer / head loops ----
        mask_bias = jnp.where(mask_ref[...] == 0.0, -1e9, 0.0)      # (A, A) f32

        # ---- encoder MLP (ReLU on every layer, incl. output) ----
        h = x_ref[...]                                 # (A, F_in) f32
        for (w, b) in enc:
            h = mm(h, w, b, relu=True)

        feats = [h]                                    # Q-net inputs (no concat)

        # ---- attention layers ----
        for l in range(n_att):
            w_vqk, b_vqk, w_o, b_o = att[l]
            # fused V|Q|K projection + vkq_activation (ReLU): (A, 3*H*kv)
            vqk = mm(h, w_vqk, b_vqk, relu=True)

            for h_i in range(num_heads):               # small static unroll
                c = h_i * kv
                v_bh = vqk[:, c:c + kv]                        # (A, kv) f32
                q_bh = vqk[:, HK + c:HK + c + kv]              # (A, kv) f32
                k_bh = vqk[:, 2 * HK + c:2 * HK + c + kv]      # (A, kv) f32

                # QK^T without materializing a transpose (contract last dims).
                s = jax.lax.dot_general(
                    q_bh.astype(MXU_DTYPE), k_bh.astype(MXU_DTYPE),
                    (((1,), (1,)), ((), ())),
                    preferred_element_type=jnp.float32) * scale

                # Pre-mask, pre-softmax scores (matches PyTorch att_weights).
                aw_refs[l][h_i] = s

                # softmax with hoisted additive mask bias
                p = s + mask_bias
                p = p - jnp.max(p, axis=-1, keepdims=True)
                p = jnp.exp(p)
                p = p * pl.reciprocal(jnp.sum(p, axis=-1, keepdims=True),
                                      approx=True)

                # att @ V (+ V skip connection, in f32); write head slice into
                # VMEM scratch instead of concatenating heads.
                o_bh = jax.lax.dot_general(
                    p.astype(MXU_DTYPE), v_bh.astype(MXU_DTYPE),
                    (((1,), (0,)), ((), ())),
                    preferred_element_type=jnp.float32) + v_bh
                head_scratch[:, c:c + kv] = o_bh

            # final projection + activation (ReLU)
            h = mm(head_scratch[...], w_o, b_o, relu=True)
            feats.append(h)

        # ---- Q-net: first layer as partial sums over feats (no concat),
        #      remaining layers pure linear ----
        w1, b1 = qnet[0]
        q = b1[...]                                    # (1, N1) f32, broadcasts
        for i, f in enumerate(feats):
            q = q + jnp.dot(f.astype(w1.dtype),
                            w1[i * hidden:(i + 1) * hidden, :],
                            preferred_element_type=jnp.float32)
        for (w, b) in qnet[1:]:
            q = mm(q, w, b, relu=False)
        q_ref[...] = q

    return kernel


# ----------------------------------------------------------------------------
# Wrapper: one pallas_call, grid over the batch dimension
# ----------------------------------------------------------------------------

def dgn_forward(x, mask, params):
    B, A, F_in = x.shape
    num_heads = params["num_heads"]
    kv = params["kv"]
    enc = params["encoder"]
    att = params["att_layers"]
    qnet = params["qnet"]
    n_enc, n_att, n_q = len(enc), len(att), len(qnet)
    hidden = enc[-1][0].shape[1]
    num_actions = qnet[-1][0].shape[1]
    HK = num_heads * kv
    M = B * A

    # Weights/biases are already bf16 / (1, n) f32 from init_params: no per-call
    # convert or reshape ops.
    inputs = [x.astype(jnp.float32), mask.astype(jnp.float32)]
    for (W, b) in enc:
        inputs += [W, b]
    for lp in att:
        inputs += [lp["Wvqk"], lp["bvqk"], lp["Wo"], lp["bo"]]
    for (W, b) in qnet:
        inputs += [W, b]

    def const_spec(shape):
        n = len(shape)
        return pl.BlockSpec(shape, lambda b, n=n: (0,) * n)   # weights: resident

    in_specs = [
        pl.BlockSpec((None, A, F_in), lambda b: (b, 0, 0)),   # x block per batch
        pl.BlockSpec((None, A, A), lambda b: (b, 0, 0)),      # mask block
    ] + [const_spec(a.shape) for a in inputs[2:]]

    out_shape = ((jax.ShapeDtypeStruct((B, A, num_actions), jnp.float32),)
                 + tuple(jax.ShapeDtypeStruct((B, num_heads, A, A), jnp.float32)
                         for _ in range(n_att)))
    out_specs = ((pl.BlockSpec((None, A, num_actions), lambda b: (b, 0, 0)),)
                 + tuple(pl.BlockSpec((None, num_heads, A, A),
                                      lambda b: (b, 0, 0, 0))
                         for _ in range(n_att)))

    # ---- cost estimate (whole call) for XLA scheduling ----
    def mm_flops(m, k, n):
        return 2 * m * k * n

    flops = 0
    for (W, _) in enc:
        flops += mm_flops(M, W.shape[0], W.shape[1])
    for lp in att:
        flops += mm_flops(M, lp["Wvqk"].shape[0], lp["Wvqk"].shape[1])
        flops += B * num_heads * (mm_flops(A, kv, A) + mm_flops(A, A, kv))
        flops += mm_flops(M, lp["Wo"].shape[0], lp["Wo"].shape[1])
    for (W, _) in qnet:
        flops += mm_flops(M, W.shape[0], W.shape[1])
    transcendentals = n_att * B * num_heads * (A * A + A)      # exp + recip
    bytes_out = sum(int(jnp.prod(jnp.array(s.shape))) * 4 for s in out_shape)
    bytes_accessed = (sum(int(a.size) * a.dtype.itemsize for a in inputs)
                      + bytes_out)

    kernel = _build_dgn_kernel(A=A, num_heads=num_heads, kv=kv, hidden=hidden,
                               n_enc=n_enc, n_att=n_att, n_q=n_q)

    outs = pl.pallas_call(
        kernel,
        out_shape=out_shape,
        grid=(B,),
        in_specs=in_specs,
        out_specs=out_specs,
        scratch_shapes=[pltpu.VMEM((A, HK), jnp.float32)],     # head assembly
        compiler_params=pltpu.CompilerParams(
            dimension_semantics=("parallel",),                 # v7x: 2 TCs
            vmem_limit_bytes=32 * 1024 * 1024),                # < 64 MiB (v7x)
        cost_estimate=pl.CostEstimate(flops=int(flops),
                                      transcendentals=int(transcendentals),
                                      bytes_accessed=int(bytes_accessed)),
    )(*inputs)

    q = outs[0]                                                # (B, A, actions)
    att_weights = list(outs[1:])                               # each (B, H, A, A)
    return q, att_weights


# ----------------------------------------------------------------------------
# Deterministic parameter init (matches nn.Linear default uniform init).
# Weights stored pre-cast to bf16, biases pre-shaped to (1, n) f32,
# V/Q/K weights fused column-wise as [V | Q | K].
# ----------------------------------------------------------------------------

def _init_linear(key, fan_in, fan_out):
    kw, kb = jax.random.split(key)
    bound = 1.0 / (fan_in ** 0.5)
    W = jax.random.uniform(kw, (fan_in, fan_out), jnp.float32, -bound, bound)
    b = jax.random.uniform(kb, (fan_out,), jnp.float32, -bound, bound)
    return W, b


def init_params(key, in_features, mlp_units, num_actions, num_heads,
                num_attention_layers, kv):
    keys = iter(jax.random.split(key, 64))
    params = {"num_heads": num_heads, "kv": kv}

    def pack(W, b):
        return (W.astype(MXU_DTYPE), b.reshape(1, -1).astype(jnp.float32))

    # encoder
    enc = []
    prev = in_features
    for units in mlp_units:
        enc.append(pack(*_init_linear(next(keys), prev, units)))
        prev = units
    params["encoder"] = enc
    hidden = prev

    # attention layers
    att = []
    for _ in range(num_attention_layers):
        Wv, bv = _init_linear(next(keys), hidden, kv * num_heads)
        Wk, bk = _init_linear(next(keys), hidden, kv * num_heads)
        Wq, bq = _init_linear(next(keys), hidden, kv * num_heads)
        Wo, bo = _init_linear(next(keys), kv * num_heads, hidden)
        att.append({
            "Wvqk": jnp.concatenate([Wv, Wq, Wk], axis=1).astype(MXU_DTYPE),
            "bvqk": jnp.concatenate([bv, bq, bk], axis=0)
                    .reshape(1, -1).astype(jnp.float32),
            "Wo": Wo.astype(MXU_DTYPE),
            "bo": bo.reshape(1, -1).astype(jnp.float32),
        })
    params["att_layers"] = att

    # q_net: hidden*(L+1) -> 1024 -> 512 -> actions (pure linear)
    q_in = hidden * (num_attention_layers + 1)
    qnet = []
    for units in (1024, 512, num_actions):
        qnet.append(pack(*_init_linear(next(keys), q_in, units)))
        q_in = units
    params["qnet"] = qnet
    return params


# ----------------------------------------------------------------------------
# Main
# ----------------------------------------------------------------------------

if __name__ == "__main__":
    B, A = 2, 8                 # batch, num_agents
    in_features = 16
    mlp_units = (64, 32)        # encoder -> hidden = 32
    num_heads = 2
    num_attention_layers = 2
    kv = 16                     # k_features == v_features
    num_actions = 4

    root = jax.random.PRNGKey(0)
    kx, km, kp = jax.random.split(root, 3)

    x = jax.random.normal(kx, (B, A, in_features), jnp.float32)
    mask = jax.random.bernoulli(km, 0.5, (B, A, A)).astype(jnp.float32)
    eye = jnp.eye(A, dtype=jnp.float32)[None]
    mask = jnp.maximum(mask, eye)   # agents always attend to themselves

    params = init_params(kp, in_features, mlp_units, num_actions,
                         num_heads, num_attention_layers, kv)

    q, att_weights = dgn_forward(x, mask, params)
    jax.block_until_ready(q)
    for aw in att_weights:
        jax.block_until_ready(aw)

    assert q.shape == (B, A, num_actions)
    assert att_weights[0].shape == (B, num_heads, A, A)
    print("KERNEL_OK")
</pallas_src>

<mosaic_0001>
module attributes {stable_mosaic.version = 11 : i64} {
  func.func @kernel(%arg0: i32, %arg1: memref<1x8x16xf32, #tpu.memory_space<vmem>>, %arg2: memref<1x8x8xf32, #tpu.memory_space<vmem>>, %arg3: memref<16x64xbf16, #tpu.memory_space<vmem>>, %arg4: memref<1x64xf32, #tpu.memory_space<vmem>>, %arg5: memref<64x32xbf16, #tpu.memory_space<vmem>>, %arg6: memref<1x32xf32, #tpu.memory_space<vmem>>, %arg7: memref<32x96xbf16, #tpu.memory_space<vmem>>, %arg8: memref<1x96xf32, #tpu.memory_space<vmem>>, %arg9: memref<32x32xbf16, #tpu.memory_space<vmem>>, %arg10: memref<1x32xf32, #tpu.memory_space<vmem>>, %arg11: memref<32x96xbf16, #tpu.memory_space<vmem>>, %arg12: memref<1x96xf32, #tpu.memory_space<vmem>>, %arg13: memref<32x32xbf16, #tpu.memory_space<vmem>>, %arg14: memref<1x32xf32, #tpu.memory_space<vmem>>, %arg15: memref<96x1024xbf16, #tpu.memory_space<vmem>>, %arg16: memref<1x1024xf32, #tpu.memory_space<vmem>>, %arg17: memref<1024x512xbf16, #tpu.memory_space<vmem>>, %arg18: memref<1x512xf32, #tpu.memory_space<vmem>>, %arg19: memref<512x4xbf16, #tpu.memory_space<vmem>>, %arg20: memref<1x4xf32, #tpu.memory_space<vmem>>, %arg21: memref<1x8x4xf32, #tpu.memory_space<vmem>>, %arg22: memref<1x2x8x8xf32, #tpu.memory_space<vmem>>, %arg23: memref<1x2x8x8xf32, #tpu.memory_space<vmem>>, %arg24: memref<8x32xf32, #tpu.memory_space<vmem>>) attributes {dimension_semantics = [#tpu.dimension_semantics<parallel>], iteration_bounds = array<i64: 2>, scalar_prefetch = 0 : i64, scratch_operands = 1 : i64, tpu.core_type = #tpu.core_type<tc>, window_params = [{transform_indices = @transform_0, window_bounds = array<i64: 1, 8, 16>}, {transform_indices = @transform_1, window_bounds = array<i64: 1, 8, 8>}, {pipeline_mode = #tpu.pipeline_mode<synchronous>, transform_indices = @transform_2, window_bounds = array<i64: 16, 64>}, {pipeline_mode = #tpu.pipeline_mode<synchronous>, transform_indices = @transform_3, window_bounds = array<i64: 1, 64>}, {pipeline_mode = #tpu.pipeline_mode<synchronous>, transform_indices = @transform_4, window_bounds = array<i64: 64, 32>}, {pipeline_mode = #tpu.pipeline_mode<synchronous>, transform_indices = @transform_5, window_bounds = array<i64: 1, 32>}, {pipeline_mode = #tpu.pipeline_mode<synchronous>, transform_indices = @transform_6, window_bounds = array<i64: 32, 96>}, {pipeline_mode = #tpu.pipeline_mode<synchronous>, transform_indices = @transform_7, window_bounds = array<i64: 1, 96>}, {pipeline_mode = #tpu.pipeline_mode<synchronous>, transform_indices = @transform_8, window_bounds = array<i64: 32, 32>}, {pipeline_mode = #tpu.pipeline_mode<synchronous>, transform_indices = @transform_9, window_bounds = array<i64: 1, 32>}, {pipeline_mode = #tpu.pipeline_mode<synchronous>, transform_indices = @transform_10, window_bounds = array<i64: 32, 96>}, {pipeline_mode = #tpu.pipeline_mode<synchronous>, transform_indices = @transform_11, window_bounds = array<i64: 1, 96>}, {pipeline_mode = #tpu.pipeline_mode<synchronous>, transform_indices = @transform_12, window_bounds = array<i64: 32, 32>}, {pipeline_mode = #tpu.pipeline_mode<synchronous>, transform_indices = @transform_13, window_bounds = array<i64: 1, 32>}, {pipeline_mode = #tpu.pipeline_mode<synchronous>, transform_indices = @transform_14, window_bounds = array<i64: 96, 1024>}, {pipeline_mode = #tpu.pipeline_mode<synchronous>, transform_indices = @transform_15, window_bounds = array<i64: 1, 1024>}, {pipeline_mode = #tpu.pipeline_mode<synchronous>, transform_indices = @transform_16, window_bounds = array<i64: 1024, 512>}, {pipeline_mode = #tpu.pipeline_mode<synchronous>, transform_indices = @transform_17, window_bounds = array<i64: 1, 512>}, {pipeline_mode = #tpu.pipeline_mode<synchronous>, transform_indices = @transform_18, window_bounds = array<i64: 512, 4>}, {pipeline_mode = #tpu.pipeline_mode<synchronous>, transform_indices = @transform_19, window_bounds = array<i64: 1, 4>}, {transform_indices = @transform_20, window_bounds = array<i64: 1, 8, 4>}, {transform_indices = @transform_21, window_bounds = array<i64: 1, 2, 8, 8>}, {transform_indices = @transform_22, window_bounds = array<i64: 1, 2, 8, 8>}]} {
    %c0 = arith.constant 0 : index
    %c0_0 = arith.constant 0 : index
    %c0_1 = arith.constant 0 : index
    %0 = vector.load %arg2[%c0, %c0_0, %c0_1] : memref<1x8x8xf32, #tpu.memory_space<vmem>>, vector<1x8x8xf32>
    %1 = vector.shape_cast %0 : vector<1x8x8xf32> to vector<8x8xf32>
    %cst = arith.constant 0.000000e+00 : f32
    %2 = vector.broadcast %cst : f32 to vector<8x8xf32>
    %3 = arith.cmpf oeq, %1, %2 : vector<8x8xf32>
    %cst_2 = arith.constant -1.000000e+09 : f32
    %cst_3 = arith.constant 0.000000e+00 : f32
    %4 = vector.broadcast %cst_2 : f32 to vector<8x8xf32>
    %5 = vector.broadcast %cst_3 : f32 to vector<8x8xf32>
    %6 = arith.select %3, %4, %5 : vector<8x8xi1>, vector<8x8xf32>
    %c0_4 = arith.constant 0 : index
    %c0_5 = arith.constant 0 : index
    %c0_6 = arith.constant 0 : index
    %7 = vector.load %arg1[%c0_4, %c0_5, %c0_6] : memref<1x8x16xf32, #tpu.memory_space<vmem>>, vector<1x8x16xf32>
    %8 = vector.shape_cast %7 : vector<1x8x16xf32> to vector<8x16xf32>
    %9 = arith.truncf %8 : vector<8x16xf32> to vector<8x16xbf16>
    %c0_7 = arith.constant 0 : index
    %c0_8 = arith.constant 0 : index
    %10 = vector.load %arg3[%c0_7, %c0_8] : memref<16x64xbf16, #tpu.memory_space<vmem>>, vector<16x64xbf16>
    %cst_9 = arith.constant dense<0.000000e+00> : vector<8x64xf32>
    %11 = tpu.matmul %9, %10, %cst_9 {dimension_numbers = #tpu.dot_dimension_numbers<[1], [0], [0], [1], [0, 0, 1, 1], [], []>} : vector<8x16xbf16>, vector<16x64xbf16>, vector<8x64xf32> -> vector<8x64xf32>
    %c0_10 = arith.constant 0 : index
    %c0_11 = arith.constant 0 : index
    %12 = vector.load %arg4[%c0_10, %c0_11] : memref<1x64xf32, #tpu.memory_space<vmem>>, vector<1x64xf32>
    %13 = vector.broadcast %12 : vector<1x64xf32> to vector<8x64xf32>
    %14 = arith.addf %11, %13 : vector<8x64xf32>
    %cst_12 = arith.constant 0.000000e+00 : f32
    %15 = vector.broadcast %cst_12 : f32 to vector<8x64xf32>
    %16 = arith.maximumf %14, %15 : vector<8x64xf32>
    %17 = arith.truncf %16 : vector<8x64xf32> to vector<8x64xbf16>
    %c0_13 = arith.constant 0 : index
    %c0_14 = arith.constant 0 : index
    %18 = vector.load %arg5[%c0_13, %c0_14] : memref<64x32xbf16, #tpu.memory_space<vmem>>, vector<64x32xbf16>
    %cst_15 = arith.constant dense<0.000000e+00> : vector<8x32xf32>
    %19 = tpu.matmul %17, %18, %cst_15 {dimension_numbers = #tpu.dot_dimension_numbers<[1], [0], [0], [1], [0, 0, 1, 1], [], []>} : vector<8x64xbf16>, vector<64x32xbf16>, vector<8x32xf32> -> vector<8x32xf32>
    %c0_16 = arith.constant 0 : index
    %c0_17 = arith.constant 0 : index
    %20 = vector.load %arg6[%c0_16, %c0_17] : memref<1x32xf32, #tpu.memory_space<vmem>>, vector<1x32xf32>
    %21 = vector.broadcast %20 : vector<1x32xf32> to vector<8x32xf32>
    %22 = arith.addf %19, %21 : vector<8x32xf32>
    %cst_18 = arith.constant 0.000000e+00 : f32
    %23 = vector.broadcast %cst_18 : f32 to vector<8x32xf32>
    %24 = arith.maximumf %22, %23 : vector<8x32xf32>
    %25 = arith.truncf %24 : vector<8x32xf32> to vector<8x32xbf16>
    %c0_19 = arith.constant 0 : index
    %c0_20 = arith.constant 0 : index
    %26 = vector.load %arg7[%c0_19, %c0_20] : memref<32x96xbf16, #tpu.memory_space<vmem>>, vector<32x96xbf16>
    %cst_21 = arith.constant dense<0.000000e+00> : vector<8x96xf32>
    %27 = tpu.matmul %25, %26, %cst_21 {dimension_numbers = #tpu.dot_dimension_numbers<[1], [0], [0], [1], [0, 0, 1, 1], [], []>} : vector<8x32xbf16>, vector<32x96xbf16>, vector<8x96xf32> -> vector<8x96xf32>
    %c0_22 = arith.constant 0 : index
    %c0_23 = arith.constant 0 : index
    %28 = vector.load %arg8[%c0_22, %c0_23] : memref<1x96xf32, #tpu.memory_space<vmem>>, vector<1x96xf32>
    %29 = vector.broadcast %28 : vector<1x96xf32> to vector<8x96xf32>
    %30 = arith.addf %27, %29 : vector<8x96xf32>
    %cst_24 = arith.constant 0.000000e+00 : f32
    %31 = vector.broadcast %cst_24 : f32 to vector<8x96xf32>
    %32 = arith.maximumf %30, %31 : vector<8x96xf32>
    %33 = vector.extract_strided_slice %32 {offsets = [0, 0], sizes = [8, 16], strides = [1, 1]} : vector<8x96xf32> to vector<8x16xf32>
    %34 = vector.extract_strided_slice %32 {offsets = [0, 32], sizes = [8, 16], strides = [1, 1]} : vector<8x96xf32> to vector<8x16xf32>
    %35 = vector.extract_strided_slice %32 {offsets = [0, 64], sizes = [8, 16], strides = [1, 1]} : vector<8x96xf32> to vector<8x16xf32>
    %36 = arith.truncf %34 : vector<8x16xf32> to vector<8x16xbf16>
    %37 = arith.truncf %35 : vector<8x16xf32> to vector<8x16xbf16>
    %cst_25 = arith.constant dense<0.000000e+00> : vector<8x8xf32>
    %38 = tpu.matmul %36, %37, %cst_25 {dimension_numbers = #tpu.dot_dimension_numbers<[1], [1], [0], [0], [0, 0, 1, 0], [], []>} : vector<8x16xbf16>, vector<8x16xbf16>, vector<8x8xf32> -> vector<8x8xf32>
    %cst_26 = arith.constant 2.500000e-01 : f32
    %39 = vector.broadcast %cst_26 : f32 to vector<8x8xf32>
    %40 = arith.mulf %38, %39 : vector<8x8xf32>
    %c0_27 = arith.constant 0 : index
    %c0_28 = arith.constant 0 : index
    %c0_29 = arith.constant 0 : index
    %c0_30 = arith.constant 0 : index
    %41 = vector.load %arg22[%c0_27, %c0_28, %c0_29, %c0_30] : memref<1x2x8x8xf32, #tpu.memory_space<vmem>>, vector<1x1x8x8xf32>
    %42 = vector.shape_cast %41 : vector<1x1x8x8xf32> to vector<8x8xf32>
    %43 = vector.shape_cast %40 : vector<8x8xf32> to vector<1x1x8x8xf32>
    tpu.vector_store %arg22[%c0_27, %c0_28, %c0_29, %c0_30], %43 {strides = array<i32>} : memref<1x2x8x8xf32, #tpu.memory_space<vmem>>, vector<1x1x8x8xf32>,
    %44 = arith.addf %40, %6 : vector<8x8xf32>
    %cst_31 = arith.constant dense<0xFF800000> : vector<8xf32>
    %45 = vector.multi_reduction <maximumf>, %44, %cst_31 [1] : vector<8x8xf32> to vector<8xf32>
    %46 = vector.shape_cast %45 : vector<8xf32> to vector<8x1xf32>
    %47 = vector.broadcast %46 : vector<8x1xf32> to vector<8x8xf32>
    %48 = arith.subf %44, %47 : vector<8x8xf32>
    %49 = math.exp %48 : vector<8x8xf32>
    %cst_32 = arith.constant dense<0.000000e+00> : vector<8xf32>
    %50 = vector.multi_reduction <add>, %49, %cst_32 [1] : vector<8x8xf32> to vector<8xf32>
    %51 = vector.shape_cast %50 : vector<8xf32> to vector<8x1xf32>
    %52 = tpu.reciprocal %51 {approx = true} : vector<8x1xf32> -> vector<8x1xf32>
    %53 = vector.broadcast %52 : vector<8x1xf32> to vector<8x8xf32>
    %54 = arith.mulf %49, %53 : vector<8x8xf32>
    %55 = arith.truncf %54 : vector<8x8xf32> to vector<8x8xbf16>
    %56 = arith.truncf %33 : vector<8x16xf32> to vector<8x16xbf16>
    %cst_33 = arith.constant dense<0.000000e+00> : vector<8x16xf32>
    %57 = tpu.matmul %55, %56, %cst_33 {dimension_numbers = #tpu.dot_dimension_numbers<[1], [0], [0], [1], [0, 0, 1, 1], [], []>} : vector<8x8xbf16>, vector<8x16xbf16>, vector<8x16xf32> -> vector<8x16xf32>
    %58 = arith.addf %57, %33 : vector<8x16xf32>
    %c0_34 = arith.constant 0 : index
    %c0_35 = arith.constant 0 : index
    %59 = vector.load %arg24[%c0_34, %c0_35] : memref<8x32xf32, #tpu.memory_space<vmem>>, vector<8x16xf32>
    tpu.vector_store %arg24[%c0_34, %c0_35], %58 {strides = array<i32>} : memref<8x32xf32, #tpu.memory_space<vmem>>, vector<8x16xf32>,
    %60 = vector.extract_strided_slice %32 {offsets = [0, 16], sizes = [8, 16], strides = [1, 1]} : vector<8x96xf32> to vector<8x16xf32>
    %61 = vector.extract_strided_slice %32 {offsets = [0, 48], sizes = [8, 16], strides = [1, 1]} : vector<8x96xf32> to vector<8x16xf32>
    %62 = vector.extract_strided_slice %32 {offsets = [0, 80], sizes = [8, 16], strides = [1, 1]} : vector<8x96xf32> to vector<8x16xf32>
    %63 = arith.truncf %61 : vector<8x16xf32> to vector<8x16xbf16>
    %64 = arith.truncf %62 : vector<8x16xf32> to vector<8x16xbf16>
    %cst_36 = arith.constant dense<0.000000e+00> : vector<8x8xf32>
    %65 = tpu.matmul %63, %64, %cst_36 {dimension_numbers = #tpu.dot_dimension_numbers<[1], [1], [0], [0], [0, 0, 1, 0], [], []>} : vector<8x16xbf16>, vector<8x16xbf16>, vector<8x8xf32> -> vector<8x8xf32>
    %cst_37 = arith.constant 2.500000e-01 : f32
    %66 = vector.broadcast %cst_37 : f32 to vector<8x8xf32>
    %67 = arith.mulf %65, %66 : vector<8x8xf32>
    %c0_38 = arith.constant 0 : index
    %c1 = arith.constant 1 : index
    %c0_39 = arith.constant 0 : index
    %c0_40 = arith.constant 0 : index
    %68 = vector.load %arg22[%c0_38, %c1, %c0_39, %c0_40] : memref<1x2x8x8xf32, #tpu.memory_space<vmem>>, vector<1x1x8x8xf32>
    %69 = vector.shape_cast %68 : vector<1x1x8x8xf32> to vector<8x8xf32>
    %70 = vector.shape_cast %67 : vector<8x8xf32> to vector<1x1x8x8xf32>
    tpu.vector_store %arg22[%c0_38, %c1, %c0_39, %c0_40], %70 {strides = array<i32>} : memref<1x2x8x8xf32, #tpu.memory_space<vmem>>, vector<1x1x8x8xf32>,
    %71 = arith.addf %67, %6 : vector<8x8xf32>
    %cst_41 = arith.constant dense<0xFF800000> : vector<8xf32>
    %72 = vector.multi_reduction <maximumf>, %71, %cst_41 [1] : vector<8x8xf32> to vector<8xf32>
    %73 = vector.shape_cast %72 : vector<8xf32> to vector<8x1xf32>
    %74 = vector.broadcast %73 : vector<8x1xf32> to vector<8x8xf32>
    %75 = arith.subf %71, %74 : vector<8x8xf32>
    %76 = math.exp %75 : vector<8x8xf32>
    %cst_42 = arith.constant dense<0.000000e+00> : vector<8xf32>
    %77 = vector.multi_reduction <add>, %76, %cst_42 [1] : vector<8x8xf32> to vector<8xf32>
    %78 = vector.shape_cast %77 : vector<8xf32> to vector<8x1xf32>
    %79 = tpu.reciprocal %78 {approx = true} : vector<8x1xf32> -> vector<8x1xf32>
    %80 = vector.broadcast %79 : vector<8x1xf32> to vector<8x8xf32>
    %81 = arith.mulf %76, %80 : vector<8x8xf32>
    %82 = arith.truncf %81 : vector<8x8xf32> to vector<8x8xbf16>
    %83 = arith.truncf %60 : vector<8x16xf32> to vector<8x16xbf16>
    %cst_43 = arith.constant dense<0.000000e+00> : vector<8x16xf32>
    %84 = tpu.matmul %82, %83, %cst_43 {dimension_numbers = #tpu.dot_dimension_numbers<[1], [0], [0], [1], [0, 0, 1, 1], [], []>} : vector<8x8xbf16>, vector<8x16xbf16>, vector<8x16xf32> -> vector<8x16xf32>
    %85 = arith.addf %84, %60 : vector<8x16xf32>
    %c0_44 = arith.constant 0 : index
    %c16 = arith.constant 16 : index
    %86 = vector.load %arg24[%c0_44, %c16] : memref<8x32xf32, #tpu.memory_space<vmem>>, vector<8x16xf32>
    tpu.vector_store %arg24[%c0_44, %c16], %85 {strides = array<i32>} : memref<8x32xf32, #tpu.memory_space<vmem>>, vector<8x16xf32>,
    %c0_45 = arith.constant 0 : index
    %c0_46 = arith.constant 0 : index
    %87 = vector.load %arg24[%c0_45, %c0_46] : memref<8x32xf32, #tpu.memory_space<vmem>>, vector<8x32xf32>
    %88 = arith.truncf %87 : vector<8x32xf32> to vector<8x32xbf16>
    %c0_47 = arith.constant 0 : index
    %c0_48 = arith.constant 0 : index
    %89 = vector.load %arg9[%c0_47, %c0_48] : memref<32x32xbf16, #tpu.memory_space<vmem>>, vector<32x32xbf16>
    %cst_49 = arith.constant dense<0.000000e+00> : vector<8x32xf32>
    %90 = tpu.matmul %88, %89, %cst_49 {dimension_numbers = #tpu.dot_dimension_numbers<[1], [0], [0], [1], [0, 0, 1, 1], [], []>} : vector<8x32xbf16>, vector<32x32xbf16>, vector<8x32xf32> -> vector<8x32xf32>
    %c0_50 = arith.constant 0 : index
    %c0_51 = arith.constant 0 : index
    %91 = vector.load %arg10[%c0_50, %c0_51] : memref<1x32xf32, #tpu.memory_space<vmem>>, vector<1x32xf32>
    %92 = vector.broadcast %91 : vector<1x32xf32> to vector<8x32xf32>
    %93 = arith.addf %90, %92 : vector<8x32xf32>
    %cst_52 = arith.constant 0.000000e+00 : f32
    %94 = vector.broadcast %cst_52 : f32 to vector<8x32xf32>
    %95 = arith.maximumf %93, %94 : vector<8x32xf32>
    %96 = arith.truncf %95 : vector<8x32xf32> to vector<8x32xbf16>
    %c0_53 = arith.constant 0 : index
    %c0_54 = arith.constant 0 : index
    %97 = vector.load %arg11[%c0_53, %c0_54] : memref<32x96xbf16, #tpu.memory_space<vmem>>, vector<32x96xbf16>
    %cst_55 = arith.constant dense<0.000000e+00> : vector<8x96xf32>
    %98 = tpu.matmul %96, %97, %cst_55 {dimension_numbers = #tpu.dot_dimension_numbers<[1], [0], [0], [1], [0, 0, 1, 1], [], []>} : vector<8x32xbf16>, vector<32x96xbf16>, vector<8x96xf32> -> vector<8x96xf32>
    %c0_56 = arith.constant 0 : index
    %c0_57 = arith.constant 0 : index
    %99 = vector.load %arg12[%c0_56, %c0_57] : memref<1x96xf32, #tpu.memory_space<vmem>>, vector<1x96xf32>
    %100 = vector.broadcast %99 : vector<1x96xf32> to vector<8x96xf32>
    %101 = arith.addf %98, %100 : vector<8x96xf32>
    %cst_58 = arith.constant 0.000000e+00 : f32
    %102 = vector.broadcast %cst_58 : f32 to vector<8x96xf32>
    %103 = arith.maximumf %101, %102 : vector<8x96xf32>
    %104 = vector.extract_strided_slice %103 {offsets = [0, 0], sizes = [8, 16], strides = [1, 1]} : vector<8x96xf32> to vector<8x16xf32>
    %105 = vector.extract_strided_slice %103 {offsets = [0, 32], sizes = [8, 16], strides = [1, 1]} : vector<8x96xf32> to vector<8x16xf32>
    %106 = vector.extract_strided_slice %103 {offsets = [0, 64], sizes = [8, 16], strides = [1, 1]} : vector<8x96xf32> to vector<8x16xf32>
    %107 = arith.truncf %105 : vector<8x16xf32> to vector<8x16xbf16>
    %108 = arith.truncf %106 : vector<8x16xf32> to vector<8x16xbf16>
    %cst_59 = arith.constant dense<0.000000e+00> : vector<8x8xf32>
    %109 = tpu.matmul %107, %108, %cst_59 {dimension_numbers = #tpu.dot_dimension_numbers<[1], [1], [0], [0], [0, 0, 1, 0], [], []>} : vector<8x16xbf16>, vector<8x16xbf16>, vector<8x8xf32> -> vector<8x8xf32>
    %cst_60 = arith.constant 2.500000e-01 : f32
    %110 = vector.broadcast %cst_60 : f32 to vector<8x8xf32>
    %111 = arith.mulf %109, %110 : vector<8x8xf32>
    %c0_61 = arith.constant 0 : index
    %c0_62 = arith.constant 0 : index
    %c0_63 = arith.constant 0 : index
    %c0_64 = arith.constant 0 : index
    %112 = vector.load %arg23[%c0_61, %c0_62, %c0_63, %c0_64] : memref<1x2x8x8xf32, #tpu.memory_space<vmem>>, vector<1x1x8x8xf32>
    %113 = vector.shape_cast %112 : vector<1x1x8x8xf32> to vector<8x8xf32>
    %114 = vector.shape_cast %111 : vector<8x8xf32> to vector<1x1x8x8xf32>
    tpu.vector_store %arg23[%c0_61, %c0_62, %c0_63, %c0_64], %114 {strides = array<i32>} : memref<1x2x8x8xf32, #tpu.memory_space<vmem>>, vector<1x1x8x8xf32>,
    %115 = arith.addf %111, %6 : vector<8x8xf32>
    %cst_65 = arith.constant dense<0xFF800000> : vector<8xf32>
    %116 = vector.multi_reduction <maximumf>, %115, %cst_65 [1] : vector<8x8xf32> to vector<8xf32>
    %117 = vector.shape_cast %116 : vector<8xf32> to vector<8x1xf32>
    %118 = vector.broadcast %117 : vector<8x1xf32> to vector<8x8xf32>
    %119 = arith.subf %115, %118 : vector<8x8xf32>
    %120 = math.exp %119 : vector<8x8xf32>
    %cst_66 = arith.constant dense<0.000000e+00> : vector<8xf32>
    %121 = vector.multi_reduction <add>, %120, %cst_66 [1] : vector<8x8xf32> to vector<8xf32>
    %122 = vector.shape_cast %121 : vector<8xf32> to vector<8x1xf32>
    %123 = tpu.reciprocal %122 {approx = true} : vector<8x1xf32> -> vector<8x1xf32>
    %124 = vector.broadcast %123 : vector<8x1xf32> to vector<8x8xf32>
    %125 = arith.mulf %120, %124 : vector<8x8xf32>
    %126 = arith.truncf %125 : vector<8x8xf32> to vector<8x8xbf16>
    %127 = arith.truncf %104 : vector<8x16xf32> to vector<8x16xbf16>
    %cst_67 = arith.constant dense<0.000000e+00> : vector<8x16xf32>
    %128 = tpu.matmul %126, %127, %cst_67 {dimension_numbers = #tpu.dot_dimension_numbers<[1], [0], [0], [1], [0, 0, 1, 1], [], []>} : vector<8x8xbf16>, vector<8x16xbf16>, vector<8x16xf32> -> vector<8x16xf32>
    %129 = arith.addf %128, %104 : vector<8x16xf32>
    %c0_68 = arith.constant 0 : index
    %c0_69 = arith.constant 0 : index
    %130 = vector.load %arg24[%c0_68, %c0_69] : memref<8x32xf32, #tpu.memory_space<vmem>>, vector<8x16xf32>
    tpu.vector_store %arg24[%c0_68, %c0_69], %129 {strides = array<i32>} : memref<8x32xf32, #tpu.memory_space<vmem>>, vector<8x16xf32>,
    %131 = vector.extract_strided_slice %103 {offsets = [0, 16], sizes = [8, 16], strides = [1, 1]} : vector<8x96xf32> to vector<8x16xf32>
    %132 = vector.extract_strided_slice %103 {offsets = [0, 48], sizes = [8, 16], strides = [1, 1]} : vector<8x96xf32> to vector<8x16xf32>
    %133 = vector.extract_strided_slice %103 {offsets = [0, 80], sizes = [8, 16], strides = [1, 1]} : vector<8x96xf32> to vector<8x16xf32>
    %134 = arith.truncf %132 : vector<8x16xf32> to vector<8x16xbf16>
    %135 = arith.truncf %133 : vector<8x16xf32> to vector<8x16xbf16>
    %cst_70 = arith.constant dense<0.000000e+00> : vector<8x8xf32>
    %136 = tpu.matmul %134, %135, %cst_70 {dimension_numbers = #tpu.dot_dimension_numbers<[1], [1], [0], [0], [0, 0, 1, 0], [], []>} : vector<8x16xbf16>, vector<8x16xbf16>, vector<8x8xf32> -> vector<8x8xf32>
    %cst_71 = arith.constant 2.500000e-01 : f32
    %137 = vector.broadcast %cst_71 : f32 to vector<8x8xf32>
    %138 = arith.mulf %136, %137 : vector<8x8xf32>
    %c0_72 = arith.constant 0 : index
    %c1_73 = arith.constant 1 : index
    %c0_74 = arith.constant 0 : index
    %c0_75 = arith.constant 0 : index
    %139 = vector.load %arg23[%c0_72, %c1_73, %c0_74, %c0_75] : memref<1x2x8x8xf32, #tpu.memory_space<vmem>>, vector<1x1x8x8xf32>
    %140 = vector.shape_cast %139 : vector<1x1x8x8xf32> to vector<8x8xf32>
    %141 = vector.shape_cast %138 : vector<8x8xf32> to vector<1x1x8x8xf32>
    tpu.vector_store %arg23[%c0_72, %c1_73, %c0_74, %c0_75], %141 {strides = array<i32>} : memref<1x2x8x8xf32, #tpu.memory_space<vmem>>, vector<1x1x8x8xf32>,
    %142 = arith.addf %138, %6 : vector<8x8xf32>
    %cst_76 = arith.constant dense<0xFF800000> : vector<8xf32>
    %143 = vector.multi_reduction <maximumf>, %142, %cst_76 [1] : vector<8x8xf32> to vector<8xf32>
    %144 = vector.shape_cast %143 : vector<8xf32> to vector<8x1xf32>
    %145 = vector.broadcast %144 : vector<8x1xf32> to vector<8x8xf32>
    %146 = arith.subf %142, %145 : vector<8x8xf32>
    %147 = math.exp %146 : vector<8x8xf32>
    %cst_77 = arith.constant dense<0.000000e+00> : vector<8xf32>
    %148 = vector.multi_reduction <add>, %147, %cst_77 [1] : vector<8x8xf32> to vector<8xf32>
    %149 = vector.shape_cast %148 : vector<8xf32> to vector<8x1xf32>
    %150 = tpu.reciprocal %149 {approx = true} : vector<8x1xf32> -> vector<8x1xf32>
    %151 = vector.broadcast %150 : vector<8x1xf32> to vector<8x8xf32>
    %152 = arith.mulf %147, %151 : vector<8x8xf32>
    %153 = arith.truncf %152 : vector<8x8xf32> to vector<8x8xbf16>
    %154 = arith.truncf %131 : vector<8x16xf32> to vector<8x16xbf16>
    %cst_78 = arith.constant dense<0.000000e+00> : vector<8x16xf32>
    %155 = tpu.matmul %153, %154, %cst_78 {dimension_numbers = #tpu.dot_dimension_numbers<[1], [0], [0], [1], [0, 0, 1, 1], [], []>} : vector<8x8xbf16>, vector<8x16xbf16>, vector<8x16xf32> -> vector<8x16xf32>
    %156 = arith.addf %155, %131 : vector<8x16xf32>
    %c0_79 = arith.constant 0 : index
    %c16_80 = arith.constant 16 : index
    %157 = vector.load %arg24[%c0_79, %c16_80] : memref<8x32xf32, #tpu.memory_space<vmem>>, vector<8x16xf32>
    tpu.vector_store %arg24[%c0_79, %c16_80], %156 {strides = array<i32>} : memref<8x32xf32, #tpu.memory_space<vmem>>, vector<8x16xf32>,
    %c0_81 = arith.constant 0 : index
    %c0_82 = arith.constant 0 : index
    %158 = vector.load %arg24[%c0_81, %c0_82] : memref<8x32xf32, #tpu.memory_space<vmem>>, vector<8x32xf32>
    %159 = arith.truncf %158 : vector<8x32xf32> to vector<8x32xbf16>
    %c0_83 = arith.constant 0 : index
    %c0_84 = arith.constant 0 : index
    %160 = vector.load %arg13[%c0_83, %c0_84] : memref<32x32xbf16, #tpu.memory_space<vmem>>, vector<32x32xbf16>
    %cst_85 = arith.constant dense<0.000000e+00> : vector<8x32xf32>
    %161 = tpu.matmul %159, %160, %cst_85 {dimension_numbers = #tpu.dot_dimension_numbers<[1], [0], [0], [1], [0, 0, 1, 1], [], []>} : vector<8x32xbf16>, vector<32x32xbf16>, vector<8x32xf32> -> vector<8x32xf32>
    %c0_86 = arith.constant 0 : index
    %c0_87 = arith.constant 0 : index
    %162 = vector.load %arg14[%c0_86, %c0_87] : memref<1x32xf32, #tpu.memory_space<vmem>>, vector<1x32xf32>
    %163 = vector.broadcast %162 : vector<1x32xf32> to vector<8x32xf32>
    %164 = arith.addf %161, %163 : vector<8x32xf32>
    %cst_88 = arith.constant 0.000000e+00 : f32
    %165 = vector.broadcast %cst_88 : f32 to vector<8x32xf32>
    %166 = arith.maximumf %164, %165 : vector<8x32xf32>
    %c0_89 = arith.constant 0 : index
    %c0_90 = arith.constant 0 : index
    %167 = vector.load %arg16[%c0_89, %c0_90] : memref<1x1024xf32, #tpu.memory_space<vmem>>, vector<1x1024xf32>
    %168 = arith.truncf %24 : vector<8x32xf32> to vector<8x32xbf16>
    %c0_91 = arith.constant 0 : index
    %c0_92 = arith.constant 0 : index
    %169 = vector.load %arg15[%c0_91, %c0_92] : memref<96x1024xbf16, #tpu.memory_space<vmem>>, vector<32x1024xbf16>
    %cst_93 = arith.constant dense<0.000000e+00> : vector<8x1024xf32>
    %170 = tpu.matmul %168, %169, %cst_93 {dimension_numbers = #tpu.dot_dimension_numbers<[1], [0], [0], [1], [0, 0, 1, 1], [], []>} : vector<8x32xbf16>, vector<32x1024xbf16>, vector<8x1024xf32> -> vector<8x1024xf32>
    %171 = vector.broadcast %167 : vector<1x1024xf32> to vector<8x1024xf32>
    %172 = arith.addf %171, %170 : vector<8x1024xf32>
    %173 = arith.truncf %95 : vector<8x32xf32> to vector<8x32xbf16>
    %c32 = arith.constant 32 : index
    %c0_94 = arith.constant 0 : index
    %174 = vector.load %arg15[%c32, %c0_94] : memref<96x1024xbf16, #tpu.memory_space<vmem>>, vector<32x1024xbf16>
    %cst_95 = arith.constant dense<0.000000e+00> : vector<8x1024xf32>
    %175 = tpu.matmul %173, %174, %cst_95 {dimension_numbers = #tpu.dot_dimension_numbers<[1], [0], [0], [1], [0, 0, 1, 1], [], []>} : vector<8x32xbf16>, vector<32x1024xbf16>, vector<8x1024xf32> -> vector<8x1024xf32>
    %176 = arith.addf %172, %175 : vector<8x1024xf32>
    %177 = arith.truncf %166 : vector<8x32xf32> to vector<8x32xbf16>
    %c64 = arith.constant 64 : index
    %c0_96 = arith.constant 0 : index
    %178 = vector.load %arg15[%c64, %c0_96] : memref<96x1024xbf16, #tpu.memory_space<vmem>>, vector<32x1024xbf16>
    %cst_97 = arith.constant dense<0.000000e+00> : vector<8x1024xf32>
    %179 = tpu.matmul %177, %178, %cst_97 {dimension_numbers = #tpu.dot_dimension_numbers<[1], [0], [0], [1], [0, 0, 1, 1], [], []>} : vector<8x32xbf16>, vector<32x1024xbf16>, vector<8x1024xf32> -> vector<8x1024xf32>
    %180 = arith.addf %176, %179 : vector<8x1024xf32>
    %181 = arith.truncf %180 : vector<8x1024xf32> to vector<8x1024xbf16>
    %c0_98 = arith.constant 0 : index
    %c0_99 = arith.constant 0 : index
    %182 = vector.load %arg17[%c0_98, %c0_99] : memref<1024x512xbf16, #tpu.memory_space<vmem>>, vector<1024x512xbf16>
    %cst_100 = arith.constant dense<0.000000e+00> : vector<8x512xf32>
    %183 = tpu.matmul %181, %182, %cst_100 {dimension_numbers = #tpu.dot_dimension_numbers<[1], [0], [0], [1], [0, 0, 1, 1], [], []>} : vector<8x1024xbf16>, vector<1024x512xbf16>, vector<8x512xf32> -> vector<8x512xf32>
    %c0_101 = arith.constant 0 : index
    %c0_102 = arith.constant 0 : index
    %184 = vector.load %arg18[%c0_101, %c0_102] : memref<1x512xf32, #tpu.memory_space<vmem>>, vector<1x512xf32>
    %185 = vector.broadcast %184 : vector<1x512xf32> to vector<8x512xf32>
    %186 = arith.addf %183, %185 : vector<8x512xf32>
    %187 = arith.truncf %186 : vector<8x512xf32> to vector<8x512xbf16>
    %c0_103 = arith.constant 0 : index
    %c0_104 = arith.constant 0 : index
    %188 = vector.load %arg19[%c0_103, %c0_104] : memref<512x4xbf16, #tpu.memory_space<vmem>>, vector<512x4xbf16>
    %cst_105 = arith.constant dense<0.000000e+00> : vector<8x4xf32>
    %189 = tpu.matmul %187, %188, %cst_105 {dimension_numbers = #tpu.dot_dimension_numbers<[1], [0], [0], [1], [0, 0, 1, 1], [], []>} : vector<8x512xbf16>, vector<512x4xbf16>, vector<8x4xf32> -> vector<8x4xf32>
    %c0_106 = arith.constant 0 : index
    %c0_107 = arith.constant 0 : index
    %190 = vector.load %arg20[%c0_106, %c0_107] : memref<1x4xf32, #tpu.memory_space<vmem>>, vector<1x4xf32>
    %191 = vector.broadcast %190 : vector<1x4xf32> to vector<8x4xf32>
    %192 = arith.addf %189, %191 : vector<8x4xf32>
    %c0_108 = arith.constant 0 : index
    %c0_109 = arith.constant 0 : index
    %c0_110 = arith.constant 0 : index
    %193 = vector.load %arg21[%c0_108, %c0_109, %c0_110] : memref<1x8x4xf32, #tpu.memory_space<vmem>>, vector<1x8x4xf32>
    %194 = vector.shape_cast %193 : vector<1x8x4xf32> to vector<8x4xf32>
    %195 = vector.shape_cast %192 : vector<8x4xf32> to vector<1x8x4xf32>
    tpu.vector_store %arg21[%c0_108, %c0_109, %c0_110], %195 {strides = array<i32>} : memref<1x8x4xf32, #tpu.memory_space<vmem>>, vector<1x8x4xf32>,
    return
  }
  func.func @transform_0(%arg0: i32) -> (i32, i32, i32) {
    %c0_i32 = arith.constant 0 : i32
    %c0_i32_0 = arith.constant 0 : i32
    %c0_i32_1 = arith.constant 0 : i32
    return %arg0, %c0_i32, %c0_i32_0 : i32, i32, i32
  }
  func.func @transform_1(%arg0: i32) -> (i32, i32, i32) {
    %c0_i32 = arith.constant 0 : i32
    %c0_i32_0 = arith.constant 0 : i32
    %c0_i32_1 = arith.constant 0 : i32
    return %arg0, %c0_i32, %c0_i32_0 : i32, i32, i32
  }
  func.func @transform_2(%arg0: i32) -> (i32, i32) {
    %c0_i32 = arith.constant 0 : i32
    %c0_i32_0 = arith.constant 0 : i32
    %c0_i32_1 = arith.constant 0 : i32
    return %c0_i32, %c0_i32_0 : i32, i32
  }
  func.func @transform_3(%arg0: i32) -> (i32, i32) {
    %c0_i32 = arith.constant 0 : i32
    %c0_i32_0 = arith.constant 0 : i32
    %c0_i32_1 = arith.constant 0 : i32
    return %c0_i32, %c0_i32_0 : i32, i32
  }
  func.func @transform_4(%arg0: i32) -> (i32, i32) {
    %c0_i32 = arith.constant 0 : i32
    %c0_i32_0 = arith.constant 0 : i32
    %c0_i32_1 = arith.constant 0 : i32
    return %c0_i32, %c0_i32_0 : i32, i32
  }
  func.func @transform_5(%arg0: i32) -> (i32, i32) {
    %c0_i32 = arith.constant 0 : i32
    %c0_i32_0 = arith.constant 0 : i32
    %c0_i32_1 = arith.constant 0 : i32
    return %c0_i32, %c0_i32_0 : i32, i32
  }
  func.func @transform_6(%arg0: i32) -> (i32, i32) {
    %c0_i32 = arith.constant 0 : i32
    %c0_i32_0 = arith.constant 0 : i32
    %c0_i32_1 = arith.constant 0 : i32
    return %c0_i32, %c0_i32_0 : i32, i32
  }
  func.func @transform_7(%arg0: i32) -> (i32, i32) {
    %c0_i32 = arith.constant 0 : i32
    %c0_i32_0 = arith.constant 0 : i32
    %c0_i32_1 = arith.constant 0 : i32
    return %c0_i32, %c0_i32_0 : i32, i32
  }
  func.func @transform_8(%arg0: i32) -> (i32, i32) {
    %c0_i32 = arith.constant 0 : i32
    %c0_i32_0 = arith.constant 0 : i32
    %c0_i32_1 = arith.constant 0 : i32
    return %c0_i32, %c0_i32_0 : i32, i32
  }
  func.func @transform_9(%arg0: i32) -> (i32, i32) {
    %c0_i32 = arith.constant 0 : i32
    %c0_i32_0 = arith.constant 0 : i32
    %c0_i32_1 = arith.constant 0 : i32
    return %c0_i32, %c0_i32_0 : i32, i32
  }
  func.func @transform_10(%arg0: i32) -> (i32, i32) {
    %c0_i32 = arith.constant 0 : i32
    %c0_i32_0 = arith.constant 0 : i32
    %c0_i32_1 = arith.constant 0 : i32
    return %c0_i32, %c0_i32_0 : i32, i32
  }
  func.func @transform_11(%arg0: i32) -> (i32, i32) {
    %c0_i32 = arith.constant 0 : i32
    %c0_i32_0 = arith.constant 0 : i32
    %c0_i32_1 = arith.constant 0 : i32
    return %c0_i32, %c0_i32_0 : i32, i32
  }
  func.func @transform_12(%arg0: i32) -> (i32, i32) {
    %c0_i32 = arith.constant 0 : i32
    %c0_i32_0 = arith.constant 0 : i32
    %c0_i32_1 = arith.constant 0 : i32
    return %c0_i32, %c0_i32_0 : i32, i32
  }
  func.func @transform_13(%arg0: i32) -> (i32, i32) {
    %c0_i32 = arith.constant 0 : i32
    %c0_i32_0 = arith.constant 0 : i32
    %c0_i32_1 = arith.constant 0 : i32
    return %c0_i32, %c0_i32_0 : i32, i32
  }
  func.func @transform_14(%arg0: i32) -> (i32, i32) {
    %c0_i32 = arith.constant 0 : i32
    %c0_i32_0 = arith.constant 0 : i32
    %c0_i32_1 = arith.constant 0 : i32
    return %c0_i32, %c0_i32_0 : i32, i32
  }
  func.func @transform_15(%arg0: i32) -> (i32, i32) {
    %c0_i32 = arith.constant 0 : i32
    %c0_i32_0 = arith.constant 0 : i32
    %c0_i32_1 = arith.constant 0 : i32
    return %c0_i32, %c0_i32_0 : i32, i32
  }
  func.func @transform_16(%arg0: i32) -> (i32, i32) {
    %c0_i32 = arith.constant 0 : i32
    %c0_i32_0 = arith.constant 0 : i32
    %c0_i32_1 = arith.constant 0 : i32
    return %c0_i32, %c0_i32_0 : i32, i32
  }
  func.func @transform_17(%arg0: i32) -> (i32, i32) {
    %c0_i32 = arith.constant 0 : i32
    %c0_i32_0 = arith.constant 0 : i32
    %c0_i32_1 = arith.constant 0 : i32
    return %c0_i32, %c0_i32_0 : i32, i32
  }
  func.func @transform_18(%arg0: i32) -> (i32, i32) {
    %c0_i32 = arith.constant 0 : i32
    %c0_i32_0 = arith.constant 0 : i32
    %c0_i32_1 = arith.constant 0 : i32
    return %c0_i32, %c0_i32_0 : i32, i32
  }
  func.func @transform_19(%arg0: i32) -> (i32, i32) {
    %c0_i32 = arith.constant 0 : i32
    %c0_i32_0 = arith.constant 0 : i32
    %c0_i32_1 = arith.constant 0 : i32
    return %c0_i32, %c0_i32_0 : i32, i32
  }
  func.func @transform_20(%arg0: i32) -> (i32, i32, i32) {
    %c0_i32 = arith.constant 0 : i32
    %c0_i32_0 = arith.constant 0 : i32
    %c0_i32_1 = arith.constant 0 : i32
    return %arg0, %c0_i32, %c0_i32_0 : i32, i32, i32
  }
  func.func @transform_21(%arg0: i32) -> (i32, i32, i32, i32) {
    %c0_i32 = arith.constant 0 : i32
    %c0_i32_0 = arith.constant 0 : i32
    %c0_i32_1 = arith.constant 0 : i32
    %c0_i32_2 = arith.constant 0 : i32
    return %arg0, %c0_i32, %c0_i32_0, %c0_i32_1 : i32, i32, i32, i32
  }
  func.func @transform_22(%arg0: i32) -> (i32, i32, i32, i32) {
    %c0_i32 = arith.constant 0 : i32
    %c0_i32_0 = arith.constant 0 : i32
    %c0_i32_1 = arith.constant 0 : i32
    %c0_i32_2 = arith.constant 0 : i32
    return %arg0, %c0_i32, %c0_i32_0, %c0_i32_1 : i32, i32, i32, i32
  }
}

</mosaic_0001>

<bundles_post_ra>
// kernel: tpu_custom_call.1
= control target key start
LH: loop header
LB: loop body
LE: loop exit
PB: predicated region body
PF: predicated region fallthrough
CT: control target
= control target key end

     0   :  { %s7022_s0 = inlined_call_operand.vmem [shape: f32[2,8,16], index: 0, kind: input, shape index: {}]   ;;  %s7023_s1 = inlined_call_operand.vmem [shape: f32[2,8,8], index: 1, kind: input, shape index: {}]   ;;  %s7024_s2 = inlined_call_operand.vmem [shape: bf16[16,64], index: 2, kind: input, shape index: {}]   ;;  %s7025_s3 = inlined_call_operand.vmem [shape: f32[1,64], index: 3, kind: input, shape index: {}]   ;;  %s7026_s4 = inlined_call_operand.vmem [shape: bf16[64,32], index: 4, kind: input, shape index: {}]   ;;  %s7027_s5 = inlined_call_operand.vmem [shape: f32[1,32], index: 5, kind: input, shape index: {}]   ;;  %s7028_s6 = inlined_call_operand.vmem [shape: bf16[32,96], index: 6, kind: input, shape index: {}]   ;;  %s7029_s7 = inlined_call_operand.vmem [shape: f32[1,96], index: 7, kind: input, shape index: {}]   ;;  %s7030_s8 = inlined_call_operand.vmem [shape: bf16[32,32], index: 8, kind: input, shape index: {}]   ;;  %s7031_s9 = inlined_call_operand.vmem [shape: f32[1,32], index: 9, kind: input, shape index: {}]   ;;  %s7032_s10 = inlined_call_operand.vmem [shape: bf16[32,96], index: 10, kind: input, shape index: {}]   ;;  %s7033_s11 = inlined_call_operand.vmem [shape: f32[1,96], index: 11, kind: input, shape index: {}]   ;;  %s7034_s12 = inlined_call_operand.vmem [shape: bf16[32,32], index: 12, kind: input, shape index: {}]   ;;  %s7035_s13 = inlined_call_operand.vmem [shape: f32[1,32], index: 13, kind: input, shape index: {}]   ;;  %s7036_s14 = inlined_call_operand.hbm [shape: bf16[96,1024], index: 14, kind: input, shape index: {}]   ;;  %s7037_s15 = inlined_call_operand.vmem [shape: f32[1,1024], index: 15, kind: input, shape index: {}]   ;;  %s7038_s16 = inlined_call_operand.hbm [shape: bf16[1024,512], index: 16, kind: input, shape index: {}]   ;;  %s7039_s17 = inlined_call_operand.vmem [shape: f32[1,512], index: 17, kind: input, shape index: {}]   ;;  %s7040_s18 = inlined_call_operand.vmem [shape: bf16[512,4], index: 18, kind: input, shape index: {}]   ;;  %s7041_s19 = inlined_call_operand.vmem [shape: f32[1,4], index: 19, kind: input, shape index: {}]   ;;  %s7042_s20 = inlined_call_operand.vmem [shape: f32[2,8,4], index: 20, kind: output, shape index: {0}]   ;;  %s7043_s21 = inlined_call_operand.hbm [shape: f32[2,2,8,8], index: 21, kind: output, shape index: {1}]   ;;  %s7044_s22 = inlined_call_operand.hbm [shape: f32[2,2,8,8], index: 22, kind: output, shape index: {2}]  }
   0x1   :  { %7063 = sst [smem:[#allocation21_spill]] %s7022_s0 }
   0x2   :  { %7064 = sst [smem:[#allocation22_spill]] %s7023_s1 }
   0x3   :  { %7065 = sst [smem:[#allocation23_spill]] %s7024_s2 }
   0x4   :  { %7066 = sst [smem:[#allocation24_spill]] %s7025_s3 }
   0x5   :  { %7067 = sst [smem:[#allocation25_spill]] %s7026_s4 }
   0x6   :  { %7068 = sst [smem:[#allocation26_spill]] %s7027_s5 }
   0x7   :  { %7069 = sst [smem:[#allocation27_spill]] %s7028_s6 }
   0x8   :  { %7070 = sst [smem:[#allocation28_spill]] %s7029_s7 }
   0x9   :  { %7071 = sst [smem:[#allocation29_spill]] %s7030_s8 }
   0xa   :  { %7072 = sst [smem:[#allocation30_spill]] %s7031_s9 }
   0xb   :  { %7073 = sst [smem:[#allocation31_spill]] %s7032_s10 }
   0xc   :  { %7074 = sst [smem:[#allocation32_spill]] %s7041_s19 }
   0xd   :  { %7075 = sst [smem:[#allocation33_spill]] %s7042_s20 }
   0xe   :  { %7076 = sst [smem:[#allocation34_spill]] %s7044_s22 }
   0xf   :  { %28 = vsyncpa [#allocation4], 0 }
  0x10   :  { %29 = vsyncpa [#allocation7], 0 }
  0x11   :  { %30 = vsyncpa [#allocation5], 0 }
  0x12   :  { %32 = vsyncpa [#allocation5 + $0x1], 0 }
  0x13   :  { %33 = vsyncpa [#allocation10], 0 }
  0x14   :  { %35 = vsyncpa [#allocation10 + $0x1], 0  ;;  %s6408_s3 = smov 0   ;;  %s6410_s28 = smov 0  }
  0x15   :  { %s6412_s29 = smov 0   ;;  %s6414_s30 = smov 0  }
  0x16 LB: > { %7077 = sst [smem:[#allocation15_spill]] %s6260_s3  ;;  %s6429_s4 = sadd.s32 4294967295, %s6272_s30   ;;  %s6272_s30 = sphi %s6414_s30, %s7115_s30   ;;  %s6268_s29 = sphi %s6412_s29, %s7117_s29   ;;  %s6264_s28 = sphi %s6410_s28, %s7119_s28   ;;  %s6260_s3 = sphi %s6408_s3, %s7118_s3  }
  0x17   : > { %7078 = sst [smem:[#allocation16_spill]] %s6268_s29  ;;  %s4937_s0 = sadd.s32 4294967294, %s6272_s30  }
  0x18   : > { %7079 = sst [smem:[#allocation17_spill]] %s6272_s30  ;;  %s6433_s23 = sadd.s32 1, %s6272_s30  }
  0x19   : > { %7080 = sst [smem:[#allocation18_spill]] %s6433_s23  ;;  %s504_s1 = sadd.s32 1, %s6268_s29 }
  0x1a   : > { %s501_s5 = ssub.s32 %s6272_s30, %s6433_s23  ;;  %p514_p0 = scmp.ne.s32.totalorder %s6268_s29, %s6264_s28 }
  0x1b   : > { %p502_p1 = scmp.eq.s32.totalorder %s501_s5, 0  ;;  %p515_p2 = scmp.eq.s32.totalorder %s6429_s4, 1 }
  0x1c   : > { %p520_p3 = scmp.ne.s32.totalorder %s6264_s28, %s6260_s3  ;;  %p521_p4 = scmp.eq.s32.totalorder %s4937_s0, 1 }
  0x1d   : > { %s6444_s24 = scalar_select %p502_p1, %s6268_s29, %s504_s1  }
  0x1e   : > { %p6446_p5 = por %p515_p2, %p514_p0  ;;  %p6450_p6 = por %p521_p4, %p520_p3 }
  0x1f   : > { %7081 = sst [smem:[#allocation19_spill]] %s6444_s24  ;;  %p4938_p7 = scmp.ge.s32.totalorder %s6272_s30, 1 }
  0x20   : > { %s7082_s6 = scalar_select %p6446_p5, 1, 0 }
  0x21   : > { %s7083_s25 = scalar_select %p6450_p6, 1, 0 }
  0x22   : > { %p554_p8 = scmp.lt.s32.totalorder %s6272_s30, 3  ;;  %p7053_p9 = scmp.eq.s32.totalorder %s6429_s4, 0 }
  0x23   : > { %7084 = sst [smem:[#allocation20_spill]] %s7083_s25  ;;  %s6274_s2 = smov [#allocation3]  }
  0x24   : > { %p6457_p10 = pnand %p4938_p7, %p554_p8  ;;  %s602_s27 = sshll.u32 %s6274_s2, 4  ;;  %s603_s27 = int_to_ptr.vmem [resolvable:$true] %s602_s27 }
  0x25   : > { %s6275_s1 = smov [#allocation6]   ;;  %s6114_s23 = scalar_lea.hbm %s7036_s14, 6144 }
  0x26   : > { %s7085_s26 = scalar_select %p6457_p10, 1, 0 }
  0x27   : > { %p5601_p11 = pneg %p6457_p10  ;;  %s618_s5 = sshll.u32 %s6275_s1, 4  ;;  %s6469_s5 = int_to_ptr.vmem [resolvable:$true] %s618_s5 }
  0x28   : > { %p6115_p13 = scmp.ne.s32.totalorder %s7036_s14, %s6114_s23  ;;  %p6121_p3 = scmp.lt.u32.totalorder %s6114_s23, %s7036_s14 }
  0x29   : > { %p6465_p12 = pnand %p7053_p9, %p5601_p11 }
  0x2b   : > { %p6116_p0 = pneg %p6465_p12 }
  0x2d   : > { %p6117_p1 = pnand %p6116_p0, %p6115_p13 }
  0x2f   : > { %p6118_p2 = pneg %p6117_p1 }
  0x31   : > { %p6123_p4 = pnand %p6121_p3, %p6118_p2 }
  0x33   : > { %6126 = shalt.err (!%p6123_p4)
}
  0x34   : > { %s6127_s1 = scalar_lea.vmem %s603_s27, 6144  ;;  %p6135_p9 = scmp.lt.s32.totalorder %s603_s27, %s603_s27 }
  0x35   : > { %p6128_p7 = scmp.ne.s32.totalorder %s603_s27, %s6127_s1  ;;  %p6136_p6 = scmp.lt.s32.totalorder %s6127_s1, %s6127_s1 }
  0x37   : > { %p6130_p8 = pnand %p6128_p7, %p6116_p0  ;;  %p6137_p5 = por %p6136_p6, %p6135_p9 }
  0x39   : > { %p6131_p11 = pneg %p6130_p8 }
  0x3b   : > { %p6138_p10 = pnand %p6137_p5, %p6131_p11 }
  0x3d   : > { %6141 = shalt.err (!%p6138_p10)
}
  0x3e   : > { %s6276_s29 = smov 512   ;;  %s6277_s24 = smov 32  }
  0x3f   : > { %5604 = dma.hbm_to_vmem [thread:$0]  (!%p6465_p12), %s7036_s14, 6144, %s603_s27, [#allocation4], %s6276_s29, %s6276_s29, %s6277_s24  }
  0x40   : > { %s6142_s2 = scalar_lea.hbm %s7038_s16, 32768 }
  0x41   : > { %p6143_p13 = scmp.ne.s32.totalorder %s7038_s16, %s6142_s2  ;;  %p6149_p9 = scmp.lt.u32.totalorder %s6142_s2, %s7038_s16 }
  0x43   : > { %p6145_p5 = pnand %p6143_p13, %p6116_p0 }
  0x45   : > { %p6146_p6 = pneg %p6145_p5 }
  0x47   : > { %p6151_p10 = pnand %p6149_p9, %p6146_p6 }
  0x49   : > { %6154 = shalt.err (!%p6151_p10)
}
  0x4a   : > { %s6155_s27 = scalar_lea.vmem %s6469_s5, 32768  ;;  %p6163_p4 = scmp.lt.s32.totalorder %s6469_s5, %s6469_s5 }
  0x4b   : > { %p6156_p1 = scmp.ne.s32.totalorder %s6469_s5, %s6155_s27  ;;  %p6164_p7 = scmp.lt.s32.totalorder %s6155_s27, %s6155_s27 }
  0x4d   : > { %p6158_p2 = pnand %p6156_p1, %p6116_p0  ;;  %p6165_p8 = por %p6164_p7, %p6163_p4 }
  0x4f   : > { %p6159_p3 = pneg %p6158_p2 }
  0x51   : > { %p6166_p11 = pnand %p6165_p8, %p6159_p3 }
  0x53   : > { %6169 = shalt.err (!%p6166_p11)
}
  0x54   : > { %s6278_s19 = smov 256   ;;  %s6279_s20 = smov 16  }
  0x55   : > { %5607 = dma.hbm_to_vmem [thread:$0]  (!%p6465_p12), %s7038_s16, 32768, %s6469_s5, [#allocation7], %s6278_s19, %s6278_s19, %s6279_s20  }
  0x56   : > { %p7087_p13 = scmp.ne.s32.totalorder %s7085_s26, 0 }
  0x57   : > { %p7088_p0 = scmp.eq.s32.totalorder (!%p7087_p13), %s6429_s4, 0 }
  0x58   : > { %657 = sbr.rel (%p7087_p13) target bundleno = 4270 (0x10ae), region = 100 }
  0x5f   : > { %6243 = dma.done.wait (%p7088_p0), [#allocation4], 6144   ;;  %p7089_p5 = pmov %p7088_p0 }
  0x60   : > { %p7090_p6 = pmov %p7088_p0 }
  0x61   : > { %6245 = vsyncadd (%p7089_p5), [#allocation4], 4294961152 }
  0x62   : > { %6247 = dma.done.wait (%p7090_p6), [#allocation7], 32768   ;;  %p7091_p9 = pmov %p7088_p0 }
  0x63   : > { %p735_p10 = scmp.lt.s32.totalorder %s6429_s4, 1  ;;  %v6280_v0 = vmov 0.0   ;;  %vm6281_vm0 = vmmov 0   ;;  %s7092_s3 = sld [smem:[#allocation21_spill]]  ;;  %vm768_vm1 = vcmask 130048   ;;  %vm853_vm2 = vcmask 523264  }
  0x64   : > { %6249 = vsyncadd (%p7091_p9), [#allocation7], 4294934528  ;;  %5423 = vmatprep.subr.bf16.mxu0 %v6280_v0  ;;  %5425 = vmatprep.mubr.msk.bf16.mxu0 %vm6281_vm0, %v6280_v0  ;;  %s7093_s2 = sld [smem:[#allocation23_spill]]  ;;  %s7094_s19 = sld [smem:[#allocation25_spill]]  ;;  %vm922_vm3 = vcmask 261120   ;;  %vm1038_vm4 = vcmask 1043456  }
  0x65   : > { %s736_s26 = scalar_select %p735_p10, %s6429_s4, 1  ;;  %5429 = vmatprep.subr.bf16.mxu1 %v6280_v0  ;;  %5437 = vmatprep.mubr.msk.bf16.mxu1 %vm6281_vm0, %v6280_v0  ;;  %vm1020_vm6 = vcmask 64512   ;;  %vm1205_vm7 = vcmask 261248  }
  0x66   : > { %s7095_s23 = sld [smem:[#allocation24_spill]]  ;;  %s7096_s1 = sld [smem:[#allocation27_spill]] }
  0x67   : > { %s6536_s0 = sshll.u32 %s736_s26, 3  ;;  %s7097_s26 = sld [smem:[#allocation26_spill]] }
  0x68   : > { %s7098_s7 = sld [smem:[#allocation28_spill]]  ;;  %s6285_s25 = smov 96  }
  0x69   : > { %s738_s30 = scalar_lea.vmem %s7092_s3, %s6536_s0  ;;  %s6282_s3 = smov 48  }
  0x6a   : > { %v5669_v1 = vld [vmem:[%s7093_s2] sm:$0xff]   ;;  %v5671_v5 = vld [vmem:[%s7094_s19 + $0x8] sm:$0xff]   ;;  %v5672_v6 = vld [vmem:[%s7094_s19 + $0x10] sm:$0xff]   ;;  %s7099_s20 = sld [smem:[#allocation22_spill]]  ;;  %s6615_s29 = sand.u32 1, %s6264_s28  }
  0x6b   : > { %v751_v2 = vld [vmem:[%s738_s30] sm:$0xff]  ;;  %5424 = vmatpush3.bf16.msra.mxu0 %v5669_v1  ;;  %v5673_v7 = vld [vmem:[%s7094_s19 + $0x18] sm:$0xff]   ;;  %s6283_s30 = smov 64   ;;  %s7058_s24 = smov 112  }
  0x6c   : > { %v752_v3 = vpack.c.bf16 %v751_v2, %v751_v2  ;;  %v5670_v4 = vld [vmem:[%s7094_s19] sm:$0xff]   ;;  %5441 = vmatprep.subr.bf16.mxu0 %v6280_v0  ;;  %v5675_v17 = vld [vmem:[%s7096_s1 + $0x8] sm:$0xff]   ;;  %s7100_s8 = sld [smem:[#allocation29_spill]]  ;;  %s7057_s2 = smov 16  }
  0x6d   : > { %5430 = vmatpush3.bf16.msra.mxu1 %v5670_v4  ;;  %v4950_v8 = vld [vmem:[%s7095_s23] ss:$0 sm:$0xff]  ;;  %s6284_s23 = smov 80   ;;  %s7101_s10 = sld [smem:[#allocation31_spill]] }
  0x6e   : > { %5426 = vmatmul.mubr.msk.bf16.vlgmr.msra.gmra.mrb[0].mxu0 %vm768_vm1, %v752_v3  ;;  %5431 = vmatprep.subr.bf16.mxu1 %v6280_v0  ;;  %v5674_v16 = vld [vmem:[%s7096_s1] sm:$0xff]   ;;  %s7102_s9 = sld [smem:[#allocation30_spill]]  ;;  %p7106_p1 = scmp.ne.s32.totalorder %s7082_s6, 0 }
  0x6f   : > { %5445 = vmatprep.mubr.msk.bf16.mxu0 %vm6281_vm0, %v6280_v0  ;;  %5442 = vmatpush3.bf16.msra.mxu0 %v5674_v16  ;;  %v4953_v18 = vld [vmem:[%s7097_s26] ss:$0 sm:$0xff]  ;;  %s7060_s26 = sshll.u32 %s6615_s29, 4 }
  0x70   : > { %5443 = vmatprep.subr.bf16.mxu0 %v6280_v0  ;;  %v4959_v26 = vld [vmem:[%s7098_s7] ss:$0 sm:$0xff]  ;;  %s742_s22 = scalar_lea.vmem %s7099_s20, %s6536_s0  ;;  %s6623_s5 = scalar_lea.vmem [#allocation8], %s7060_s26 }
  0x71   : > { %5432 = vmatpush3.bf16.msra.mxu1 %v5671_v5  ;;  %v748_v41 = vld [vmem:[%s742_s22] sm:$0xff]  ;;  %s7105_s22 = smov 16   ;;  %s4748_s20 = scalar_lea.sflag [#allocation5], %s6615_s29 }
  0x72   : > { %5433 = vmatprep.subr.bf16.mxu1 %v6280_v0  ;;  %vm749_vm5 = vcmp.eq.f32.partialorder %v748_v41, 0.0  ;;  %v5677_v16 = vld [vmem:[%s7100_s8 + $0x8] sm:$0xff]   ;;  %v4972_v41 = vld [vmem:[%s7033_s11] ss:$0 sm:$0xff] }
  0x73   : > { %5444 = vmatpush3.bf16.msra.mxu0 %v5675_v17  ;;  %v6619_v43 = vsel %vm749_vm5, -1e+09, %v6280_v0 }
  0x74   : > { %5449 = vmatprep.subr.bf16.mxu0 %v6280_v0 }
  0x75   : > { %5434 = vmatpush3.bf16.msra.mxu1 %v5672_v6 }
  0x76   : > { %5435 = vmatprep.subr.bf16.mxu1 %v6280_v0 }
  0x79   : > { %5436 = vmatpush3.bf16.msra.mxu1 %v5673_v7 }
  0x7a   : > { %5455 = vmatprep.subr.bf16.mxu1 %v6280_v0 }
 0x141   : > { %v806_v9 = vpop.f32.mrb[0].mxu0 }
 0x142   : > { %v807_v10 = vadd.f32 %v4950_v8, %v806_v9  ;;  %v5427_v11 = vpop.f32.mrb[1].mxu0 }
 0x143   : > { %v809_v12 = vpop.f32.mrb[2].mxu0 }
 0x144   : > { %v812_v13 = vmax.f32 %v807_v10, 0.0  ;;  %v5428_v14 = vpop.f32.mrb[3].mxu0 }
 0x145   : > { %v5676_v14 = vld [vmem:[%s7100_s8] sm:$0xff]  }
 0x146   : > { %v813_v15 = vpack.c.bf16 %v812_v13, %v812_v13 }
 0x148   : > { %5438 = vmatmul.mubr.msk.bf16.vlgmr.msra.gmra.mrb[0].mxu1 %vm853_vm2, %v813_v15 }
 0x149   : > { %5457 = vmatprep.mubr.msk.bf16.mxu1 %vm6281_vm0, %v6280_v0 }
 0x21b   : > { %v891_v19 = vpop.f32.mrb[0].mxu1 }
 0x21c   : > { %v892_v20 = vadd.f32 %v4953_v18, %v891_v19  ;;  %v5439_v21 = vpop.f32.mrb[1].mxu1 }
 0x21d   : > { %v894_v22 = vpop.f32.mrb[2].mxu1 }
 0x21e   : > { %v897_v23 = vmax.f32 %v892_v20, 0.0  ;;  %v5440_v24 = vpop.f32.mrb[3].mxu1 }
 0x220   : > { %v6581_v25 = vpack.c.bf16 %v897_v23, %v897_v23 }
 0x222   : > { %5446 = vmatmul.mubr.msk.bf16.vlgmr.msra.gmra.mrb[4].mxu0 %vm922_vm3, %v6581_v25 }
 0x223   : > { %5451 = vmatprep.mubr.msk.bf16.mxu0 %vm6281_vm0, %v6280_v0 }
 0x2f5   : > { %v960_v27 = vpop.f32.mrb[4].mxu0 }
 0x2f6   : > { %v961_v28 = vadd.f32 %v4959_v26, %v960_v27  ;;  %v5447_v29 = vpop.f32.mrb[5].mxu0 }
 0x2f7   : > { %v963_v30 = vpop.f32.mrb[6].mxu0 }
 0x2f8   : > { %v6590_v31 = vmax.f32 %v961_v28, 0.0  ;;  %v5448_v32 = vpop.f32.mrb[7].mxu0 }
 0x2f9   : > { %v5679_v32 = vld [vmem:[%s7101_s10 + $0x8] sm:$0xff]  }
 0x2fa   : > { %v967_v33 = vpack.c.bf16 %v6590_v31, %v6590_v31 }
 0x2fc   : > { %1085 = vrot.lane.b32.xlu1 %v967_v33, %s6282_s3  ;;  %971 = vrot.lane.b32.xlu0 %v967_v33, %s6283_s30  ;;  %v1040_v34 = vsel %vm1038_vm4, %v967_v33, 0 }
 0x2fd   : > { %5456 = vmatpush3.bf16.msra.mxu1 %v1040_v34 }
 0x2fe   : > { %5467 = vmatprep.subr.bf16.mxu1 %v6280_v0 }
 0x300   : > { %1083 = vrot.lane.b32.xlu1 %v967_v33, %s6284_s23  ;;  %969 = vrot.lane.b32.xlu0 %v967_v33, %s6285_s25 }
 0x36e   : > { %v972_v35 = vpop.permute.xlu0 %971  ;;  %v1086_v37 = vpop.permute.xlu1 %1085 }
 0x36f   : > { %v977_v36 = vsel %vm768_vm1, %v972_v35, 0  ;;  %v1091_v39 = vsel %vm768_vm1, %v1086_v37, 0 }
 0x370   : > { %5450 = vmatpush3.bf16.xpose.msra.mxu0 %v977_v36 }
 0x371   : > { %5461 = vmatprep.subr.bf16.mxu0 %v6280_v0 }
 0x372   : > { %v970_v38 = vpop.permute.xlu0 %969  ;;  %v1084_v40 = vpop.permute.xlu1 %1083 }
 0x377   : > { %5452 = vmatmul.mubr.msk.bf16.vlgmr.msra.gmra.mrb[8].mxu0 %vm768_vm1, %v970_v38 }
 0x378   : > { %5462 = vmatpush3.bf16.xpose.msra.mxu0 %v1091_v39  ;;  %5463 = vmatprep.mubr.msk.bf16.mxu0 %vm6281_vm0, %v6280_v0 }
 0x379   : > { %5473 = vmatprep.subr.bf16.mxu0 %v6280_v0 }
 0x37f   : > { %5464 = vmatmul.mubr.msk.bf16.vlgmr.msra.gmra.mrb[12].mxu0 %vm768_vm1, %v1084_v40 }
 0x380   : > { %5477 = vmatprep.mubr.msk.bf16.mxu0 %vm6281_vm0, %v6280_v0  ;;  %5474 = vmatpush3.bf16.msra.mxu0 %v5676_v14 }
 0x381   : > { %5475 = vmatprep.subr.bf16.mxu0 %v6280_v0 }
 0x384   : > { %5476 = vmatpush3.bf16.msra.mxu0 %v5677_v16 }
 0x385   : > { %5489 = vmatprep.subr.bf16.mxu0 %v6280_v0 }
 0x44a   : > { %v1013_v42 = vpop.f32.mrb[8].mxu0 }
 0x44b   : > { %v1019_v44 = vmul.f32 0.25, %v1013_v42  ;;  %v5453_v45 = vpop.f32.mrb[9].mxu0 }
 0x44c   : > { %v1016_v46 = vpop.f32.mrb[10].mxu0 }
 0x44d   : > { %1021 = vst.msk [vmem:[%s6623_s5] sm:$0xff] %vm1020_vm6, %v1019_v44  ;;  %v5454_v47 = vpop.f32.mrb[11].mxu0  ;;  %v1022_v48 = vadd.f32 %v1019_v44, %v6619_v43 }
 0x44f   : > { %v1023_v49 = vsel %vm1020_vm6, %v1022_v48, -inf }
 0x450   : > { %1024 = vmax.xlane.f32.xlu0 %v1023_v49 }
 0x452   : > { %v1127_v50 = vpop.f32.mrb[12].mxu0 }
 0x453   : > { %v1133_v51 = vmul.f32 0.25, %v1127_v50  ;;  %v5465_v52 = vpop.f32.mrb[13].mxu0 }
 0x454   : > { %v1130_v53 = vpop.f32.mrb[14].mxu0 }
 0x455   : > { %4966 = vst.msk [vmem:[%s6623_s5 + $0x8] sm:$0xff] %vm1020_vm6, %v1133_v51  ;;  %v5466_v54 = vpop.f32.mrb[15].mxu0  ;;  %v1136_v55 = vadd.f32 %v1133_v51, %v6619_v43 }
 0x457   : > { %v1137_v56 = vsel %vm1020_vm6, %v1136_v55, -inf }
 0x458   : > { %1138 = vmax.xlane.f32.xlu1 %v1137_v56 }
 0x469   : > { %1149 = vrot.lane.b32.xlu1 %v967_v33, %s7058_s24  ;;  %v4968_v33 = vld [vmem:[%s7102_s9] ss:$0 sm:$0xff] }
 0x4dd   : > { %v1025_v57 = vpop.xlane.xlu0 %1024 }
 0x4de   : > { %v1026_v58 = vsub.f32 %v1022_v48, %v1025_v57 }
 0x4e0   : > { %v1027_v59 = vmul.f32 1.442695, %v1026_v58 }
 0x4e2   : > { %6098 = vpow2.f32 %v1027_v59 }
 0x4e5   : > { %v1139_v60 = vpop.xlane.xlu1 %1138 }
 0x4e6   : > { %v1140_v61 = vsub.f32 %v1136_v55, %v1139_v60 }
 0x4e8   : > { %v1141_v62 = vmul.f32 1.442695, %v1140_v61 }
 0x4e9   : > { %v1150_v8 = vpop.permute.xlu1 %1149 }
 0x4ea   : > { %6100 = vpow2.f32 %v1141_v62  ;;  %v1159_v10 = vsel %vm1038_vm4, %v1150_v8, 0 }
 0x4ec   : > { %v6099_v63 = vpop.eup %6098 }
 0x4ed   : > { %v1029_v1 = vsel %vm1020_vm6, %v6099_v63, 0.0 }
 0x4ee   : > { %1030 = vadd.xlane.f32.xlu0 %v1029_v1 }
 0x4f4   : > { %v6101_v2 = vpop.eup %6100 }
 0x4f5   : > { %v1143_v3 = vsel %vm1020_vm6, %v6101_v2, 0.0 }
 0x4f6   : > { %1144 = vadd.xlane.f32.xlu0 %v1143_v3 }
 0x50c   : > { %1152 = vrot.lane.b32.xlu0 %v6590_v31, %s7058_s24 }
 0x57b   : > { %v1031_v4 = vpop.xlane.xlu0 %1030 }
 0x57c   : > { %6102 = vrcp.f32 %v1031_v4 }
 0x583   : > { %v1145_v5 = vpop.xlane.xlu0 %1144 }
 0x584   : > { %6104 = vrcp.f32 %v1145_v5 }
 0x586   : > { %v6103_v6 = vpop.eup %6102 }
 0x587   : > { %v1033_v7 = vmul.f32 %v6103_v6, %v6099_v63  ;;  %v1153_v21 = vpop.permute.xlu0 %1152 }
 0x589   : > { %v1034_v9 = vpack.c.bf16 %v1033_v7, %v1033_v7 }
 0x58b   : > { %5458 = vmatmul.mubr.msk.bf16.vlgmr.msra.gmra.mrb[4].mxu1 %vm1020_vm6, %v1034_v9 }
 0x58c   : > { %5468 = vmatpush3.bf16.msra.mxu1 %v1159_v10  ;;  %5469 = vmatprep.mubr.msk.bf16.mxu1 %vm6281_vm0, %v6280_v0 }
 0x58d   : > { %5481 = vmatprep.subr.bf16.mxu1 %v6280_v0 }
 0x58e   : > { %v6105_v11 = vpop.eup %6104 }
 0x58f   : > { %v1147_v12 = vmul.f32 %v6105_v11, %v6101_v2 }
 0x591   : > { %v1148_v13 = vpack.c.bf16 %v1147_v12, %v1147_v12 }
 0x593   : > { %5470 = vmatmul.mubr.msk.bf16.vlgmr.msra.gmra.mrb[8].mxu1 %vm1020_vm6, %v1148_v13 }
 0x594   : > { %5485 = vmatprep.mubr.msk.bf16.mxu1 %vm6281_vm0, %v6280_v0 }
 0x65e   : > { %v1076_v15 = vpop.f32.mrb[4].mxu1 }
 0x65f   : > { %v1077_v17 = vadd.f32 %v1076_v15, %v6590_v31  ;;  %v5459_v18 = vpop.f32.mrb[5].mxu1  ;;  %v5678_v31 = vld [vmem:[%s7101_s10] sm:$0xff]  }
 0x660   : > { %v1079_v19 = vpop.f32.mrb[6].mxu1  ;;  %5482 = vmatpush3.bf16.msra.mxu1 %v5678_v31 }
 0x661   : > { %1082 = vst.msk [vmem:[#allocation2] sm:$0xff] %vm768_vm1, %v1077_v17  ;;  %v5460_v20 = vpop.f32.mrb[7].mxu1  ;;  %5483 = vmatprep.subr.bf16.mxu1 %v6280_v0 }
 0x662   : > { %v1651_v20 = vld [vmem:[#allocation3] sm:$0xff] }
 0x664   : > { %5484 = vmatpush3.bf16.msra.mxu1 %v5679_v32 }
 0x665   : > { %5495 = vmatprep.subr.bf16.mxu1 %v6280_v0 }
 0x666   : > { %v1195_v22 = vpop.f32.mrb[8].mxu1 }
 0x667   : > { %v1196_v23 = vadd.f32 %v1195_v22, %v1153_v21  ;;  %v5471_v24 = vpop.f32.mrb[9].mxu1  ;;  %v1655_v21 = vld [vmem:[#allocation3 + $0x20] sm:$0xff] }
 0x668   : > { %v1198_v26 = vpop.f32.mrb[10].mxu1  ;;  %v4985_v32 = vcombine.low %v1651_v20, %v1655_v21 }
 0x669   : > { %v5472_v27 = vpop.f32.mrb[11].mxu1  ;;  %1202 = vrot.lane.b32.xlu1 %v1196_v23, %s7057_s2  ;;  %v4986_v26 = vcombine.high %v1651_v20, %v1655_v21  ;;  %v1660_v20 = vld [vmem:[#allocation3 + $0x48] sm:$0xff] }
 0x66a   : > { %v1664_v21 = vld [vmem:[#allocation3 + $0x68] sm:$0xff] }
 0x6db   : > { %v1203_v28 = vpop.permute.xlu1 %1202 }
 0x6dc   : > { %1206 = vst.msk [vmem:[#allocation2] sm:$0xff] %vm1205_vm7, %v1203_v28 }
 0x6e3   : > { %v1207_v29 = vld [vmem:[#allocation2] sm:$0xff] }
 0x6e4   : > { %v1208_v30 = vpack.c.bf16 %v1207_v29, %v1207_v29  ;;  %v1659_v29 = vld [vmem:[#allocation3 + $0x40] sm:$0xff] }
 0x6e6   : > { %5478 = vmatmul.mubr.msk.bf16.vlgmr.msra.gmra.mrb[16].mxu0 %vm922_vm3, %v1208_v30  ;;  %v1663_v30 = vld [vmem:[#allocation3 + $0x60] sm:$0xff] }
 0x6e7   : > { %5491 = vmatprep.mubr.msk.bf16.mxu0 %vm6281_vm0, %v6280_v0 }
 0x7b9   : > { %v1269_v34 = vpop.f32.mrb[16].mxu0 }
 0x7ba   : > { %v1270_v35 = vadd.f32 %v4968_v33, %v1269_v34  ;;  %v5479_v36 = vpop.f32.mrb[17].mxu0  ;;  %v4994_v34 = vcombine.high %v1659_v29, %v1663_v30 }
 0x7bb   : > { %v1272_v37 = vpop.f32.mrb[18].mxu0  ;;  %v1657_v36 = vld [vmem:[#allocation3 + $0x30] sm:$0xff] }
 0x7bc   : > { %v1275_v38 = vmax.f32 %v1270_v35, 0.0  ;;  %v5480_v39 = vpop.f32.mrb[19].mxu0  ;;  %v1653_v35 = vld [vmem:[#allocation3 + $0x10] sm:$0xff]  ;;  %v4993_v37 = vcombine.low %v1659_v29, %v1663_v30  ;;  %v1662_v30 = vld [vmem:[#allocation3 + $0x58] sm:$0xff] }
 0x7bd   : > { %v4990_v39 = vcombine.high %v1653_v35, %v1657_v36 }
 0x7be   : > { %v6672_v40 = vpack.c.bf16 %v1275_v38, %v1275_v38  ;;  %v6288_v38 = vmov 0  }
 0x7c0   : > { %5486 = vmatmul.mubr.msk.bf16.vlgmr.msra.gmra.mrb[12].mxu1 %vm922_vm3, %v6672_v40 }
 0x7c1   : > { %5497 = vmatprep.mubr.msk.bf16.mxu1 %vm6281_vm0, %v6280_v0 }
 0x893   : > { %v1337_v42 = vpop.f32.mrb[12].mxu1 }
 0x894   : > { %v1338_v44 = vadd.f32 %v4972_v41, %v1337_v42  ;;  %v5487_v45 = vpop.f32.mrb[13].mxu1  ;;  %v1661_v41 = vld [vmem:[#allocation3 + $0x50] sm:$0xff] }
 0x895   : > { %v1340_v46 = vpop.f32.mrb[14].mxu1  ;;  %v1665_v42 = vld [vmem:[#allocation3 + $0x70] sm:$0xff] }
 0x896   : > { %v6681_v47 = vmax.f32 %v1338_v44, 0.0  ;;  %v5488_v48 = vpop.f32.mrb[15].mxu1  ;;  %v4989_v44 = vcombine.low %v1653_v35, %v1657_v36  ;;  %v4998_v45 = vcombine.high %v1661_v41, %v1665_v42  ;;  %v1960_v46 = vld [vmem:[#allocation3 + $0x80] sm:$0xff]  ;;  %v1965_v35 = vld [vmem:[#allocation3 + $0xa8] sm:$0xff] }
 0x897   : > { %v1964_v48 = vld [vmem:[#allocation3 + $0xa0] sm:$0xff] }
 0x898   : > { %v1344_v49 = vpack.c.bf16 %v6681_v47, %v6681_v47 }
 0x89a   : > { %1346 = vrot.lane.b32.xlu0 %v1344_v49, %s6285_s25  ;;  %1348 = vrot.lane.b32.xlu1 %v1344_v49, %s6283_s30  ;;  %v1415_v50 = vsel %vm1038_vm4, %v1344_v49, 0  ;;  %s7062_s25 = sshll.u32 %s6429_s4, 8 }
 0x89b   : > { %5496 = vmatpush3.bf16.msra.mxu1 %v1415_v50  ;;  %v5006_v50 = vcombine.high %v1960_v46, %v1964_v48  ;;  %s6935_s24 = scalar_lea.hbm %s7043_s21, %s7062_s25 }
 0x89c   : > { %5507 = vmatprep.subr.bf16.mxu1 %v6280_v0 }
 0x89e   : > { %1458 = vrot.lane.b32.xlu0 %v1344_v49, %s6284_s23  ;;  %1460 = vrot.lane.b32.xlu1 %v1344_v49, %s6282_s3  ;;  %s7103_s3 = sshll.u32 %s6615_s29, 4  ;;  %s7104_s23 = smov 112  }
 0x89f   : > { %s6703_s30 = scalar_lea.vmem [#allocation9], %s7103_s3  ;;  %s4769_s3 = sshll.u32 %s6623_s5, 4  ;;  %s6925_s3 = int_to_ptr.vmem [resolvable:$true] %s4769_s3 }
 0x8a0   : > { %s6289_s5 = smov [#allocation8]  }
 0x90c   : > { %v1349_v51 = vpop.permute.xlu1 %1348  ;;  %v1347_v54 = vpop.permute.xlu0 %1346 }
 0x90d   : > { %v1354_v52 = vsel %vm768_vm1, %v1349_v51, 0  ;;  %v1968_v51 = vld [vmem:[#allocation3 + $0xc0] sm:$0xff] }
 0x90e   : > { %5490 = vmatpush3.bf16.xpose.msra.mxu0 %v1354_v52  ;;  %v1972_v52 = vld [vmem:[#allocation3 + $0xe0] sm:$0xff] }
 0x90f   : > { %5501 = vmatprep.subr.bf16.mxu0 %v6280_v0 }
 0x910   : > { %v1461_v53 = vpop.permute.xlu1 %1460  ;;  %v1459_v56 = vpop.permute.xlu0 %1458 }
 0x911   : > { %v1466_v55 = vsel %vm768_vm1, %v1461_v53, 0  ;;  %v5005_v53 = vcombine.low %v1960_v46, %v1964_v48  ;;  %v1967_v46 = vld [vmem:[#allocation3 + $0xb8] sm:$0xff] }
 0x915   : > { %5492 = vmatmul.mubr.msk.bf16.vlgmr.msra.gmra.mrb[20].mxu0 %vm768_vm1, %v1347_v54  ;;  %v5014_v54 = vcombine.high %v1968_v51, %v1972_v52 }
 0x916   : > { %5502 = vmatpush3.bf16.xpose.msra.mxu0 %v1466_v55  ;;  %5503 = vmatprep.mubr.msk.bf16.mxu0 %vm6281_vm0, %v6280_v0  ;;  %v1962_v55 = vld [vmem:[#allocation3 + $0x90] sm:$0xff] }
 0x917   : > { %5513 = vmatprep.subr.bf16.mxu0 %v6280_v0 }
 0x91d   : > { %5504 = vmatmul.mubr.msk.bf16.vlgmr.msra.gmra.mrb[24].mxu0 %vm768_vm1, %v1459_v56  ;;  %v1966_v56 = vld [vmem:[#allocation3 + $0xb0] sm:$0xff] }
 0x91e   : > { %5517 = vmatprep.mubr.msk.bf16.mxu0 %vm6281_vm0, %v6280_v0 }
 0x9e8   : > { %v1390_v57 = vpop.f32.mrb[20].mxu0 }
 0x9e9   : > { %v1396_v58 = vmul.f32 0.25, %v1390_v57  ;;  %v5493_v59 = vpop.f32.mrb[21].mxu0  ;;  %v5013_v57 = vcombine.low %v1968_v51, %v1972_v52  ;;  %v1975_v51 = vld [vmem:[#allocation3 + $0xf8] sm:$0xff] }
 0x9ea   : > { %v1393_v60 = vpop.f32.mrb[22].mxu0  ;;  %v1970_v59 = vld [vmem:[#allocation3 + $0xd0] sm:$0xff] }
 0x9eb   : > { %1397 = vst.msk [vmem:[%s6703_s30] sm:$0xff] %vm1020_vm6, %v1396_v58  ;;  %v5494_v61 = vpop.f32.mrb[23].mxu0  ;;  %v1398_v62 = vadd.f32 %v1396_v58, %v6619_v43  ;;  %v5010_v58 = vcombine.high %v1962_v55, %v1966_v56  ;;  %v1974_v60 = vld [vmem:[#allocation3 + $0xf0] sm:$0xff] }
 0x9ec   : > { %v5009_v61 = vcombine.low %v1962_v55, %v1966_v56  ;;  %v2234_v55 = vld [vmem:[#allocation3 + $0x128] sm:$0xff] }
 0x9ed   : > { %v1399_v63 = vsel %vm1020_vm6, %v1398_v62, -inf }
 0x9ee   : > { %1400 = vmax.xlane.f32.xlu1 %v1399_v63  ;;  %v5017_v63 = vcombine.low %v1970_v59, %v1974_v60 }
 0x9f0   : > { %v1502_v1 = vpop.f32.mrb[24].mxu0 }
 0x9f1   : > { %v1508_v2 = vmul.f32 0.25, %v1502_v1  ;;  %v5505_v3 = vpop.f32.mrb[25].mxu0  ;;  %v5680_v1 = vld [vmem:[%s7034_s12] sm:$0xff]  }
 0x9f2   : > { %v1505_v4 = vpop.f32.mrb[26].mxu0  ;;  %5514 = vmatpush3.bf16.msra.mxu0 %v5680_v1  ;;  %v5681_v3 = vld [vmem:[%s7034_s12 + $0x8] sm:$0xff]  }
 0x9f3   : > { %4979 = vst.msk [vmem:[%s6703_s30 + $0x8] sm:$0xff] %vm1020_vm6, %v1508_v2  ;;  %v5506_v5 = vpop.f32.mrb[27].mxu0  ;;  %v1511_v6 = vadd.f32 %v1508_v2, %v6619_v43  ;;  %5515 = vmatprep.subr.bf16.mxu0 %v6280_v0 }
 0x9f5   : > { %v1512_v7 = vsel %vm1020_vm6, %v1511_v6, -inf }
 0x9f6   : > { %1513 = vmax.xlane.f32.xlu0 %v1512_v7  ;;  %5516 = vmatpush3.bf16.msra.mxu0 %v5681_v3  ;;  %v2231_v3 = vld [vmem:[#allocation3 + $0x110] sm:$0xff] }
 0xa7b   : > { %v1401_v8 = vpop.xlane.xlu1 %1400 }
 0xa7c   : > { %v1402_v9 = vsub.f32 %v1398_v62, %v1401_v8  ;;  %v5018_v62 = vcombine.high %v1970_v59, %v1974_v60  ;;  %v1652_v8 = vld [vmem:[#allocation3 + $0x8] sm:$0xff]  ;;  %v2241_v59 = vld [vmem:[#allocation3 + $0x160] sm:$0xff] }
 0xa7d   : > { %v2238_v60 = vld [vmem:[#allocation3 + $0x148] sm:$0xff] }
 0xa7e   : > { %v1403_v10 = vmul.f32 1.442695, %v1402_v9  ;;  %v1656_v9 = vld [vmem:[#allocation3 + $0x28] sm:$0xff] }
 0xa80   : > { %6106 = vpow2.f32 %v1403_v10  ;;  %v4988_v10 = vcombine.high %v1652_v8, %v1656_v9 }
 0xa82   : > { %1788 = vmatprep.subr.bf16.mxu0 %v4988_v10  ;;  %v4981_v10 = vld [vmem:[%s7035_s13] ss:$0 sm:$0xff] }
 0xa83   : > { %v1514_v11 = vpop.xlane.xlu0 %1513 }
 0xa84   : > { %v1515_v12 = vsub.f32 %v1511_v6, %v1514_v11 }
 0xa86   : > { %v1516_v13 = vmul.f32 1.442695, %v1515_v12 }
 0xa88   : > { %6108 = vpow2.f32 %v1516_v13  ;;  %v4987_v13 = vcombine.low %v1652_v8, %v1656_v9 }
 0xa8a   : > { %v6107_v14 = vpop.eup %6106 }
 0xa8b   : > { %v1405_v15 = vsel %vm1020_vm6, %v6107_v14, 0.0 }
 0xa8c   : > { %1406 = vadd.xlane.f32.xlu0 %v1405_v15 }
 0xa92   : > { %v6109_v16 = vpop.eup %6108 }
 0xa93   : > { %v1518_v17 = vsel %vm1020_vm6, %v6109_v16, 0.0 }
 0xa94   : > { %1519 = vadd.xlane.f32.xlu1 %v1518_v17  ;;  %v2229_v17 = vld [vmem:[#allocation3 + $0x100] sm:$0xff] }
 0xaa2   : > { %1524 = vrot.lane.b32.xlu0 %v1344_v49, %s7104_s23  ;;  %v4997_v49 = vcombine.low %v1661_v41, %v1665_v42  ;;  %v1973_v41 = vld [vmem:[#allocation3 + $0xe8] sm:$0xff] }
 0xaa5   : > { %1527 = vrot.lane.b32.xlu1 %v6681_v47, %s7104_s23  ;;  %s4785_s23 = sshll.u32 %s6703_s30, 4  ;;  %s6174_s30 = sshll.u32 %s6289_s5, 4  ;;  %s6927_s23 = int_to_ptr.vmem [resolvable:$true] %s4785_s23  ;;  %s6175_s30 = int_to_ptr.vmem [resolvable:$false] %s6174_s30 }
 0xaa6   : > { %s6176_s2 = scalar_lea.vmem %s6175_s30, 512  ;;  %p6177_p4 = scmp.lt.s32.totalorder %s6925_s3, %s6175_s30 }
 0xb19   : > { %v1407_v43 = vpop.xlane.xlu0 %1406 }
 0xb1a   : > { %6110 = vrcp.f32 %v1407_v43 }
 0xb1d   : > { %v1525_v23 = vpop.permute.xlu0 %1524 }
 0xb1e   : > { %v1534_v27 = vsel %vm1038_vm4, %v1525_v23, 0 }
 0xb21   : > { %v1520_v18 = vpop.xlane.xlu1 %1519 }
 0xb22   : > { %6112 = vrcp.f32 %v1520_v18 }
 0xb24   : > { %v6111_v19 = vpop.eup %6110 }
 0xb25   : > { %v1409_v22 = vmul.f32 %v6111_v19, %v6107_v14  ;;  %v1528_v11 = vpop.permute.xlu1 %1527 }
 0xb27   : > { %v1410_v24 = vpack.c.bf16 %v1409_v22, %v1409_v22 }
 0xb29   : > { %5498 = vmatmul.mubr.msk.bf16.vlgmr.msra.gmra.mrb[16].mxu1 %vm1020_vm6, %v1410_v24  ;;  %v4996_v24 = vcombine.high %v1660_v20, %v1664_v21 }
 0xb2a   : > { %5508 = vmatpush3.bf16.msra.mxu1 %v1534_v27  ;;  %5509 = vmatprep.mubr.msk.bf16.mxu1 %vm6281_vm0, %v6280_v0  ;;  %v2233_v0 = vld [vmem:[#allocation3 + $0x120] sm:$0xff]  ;;  %v1658_v27 = vld [vmem:[#allocation3 + $0x38] sm:$0xff] }
 0xb2b   : > { %1747 = vmatprep.subr.bf16.mxu1 %v4986_v26  ;;  %v5025_v43 = vcombine.low %v2229_v17, %v2233_v0  ;;  %v5026_v18 = vcombine.high %v2229_v17, %v2233_v0  ;;  %v1654_v26 = vld [vmem:[#allocation3 + $0x18] sm:$0xff] }
 0xb2c   : > { %v6113_v28 = vpop.eup %6112  ;;  %v4992_v29 = vcombine.high %v1654_v26, %v1658_v27  ;;  %v2244_v17 = vld [vmem:[#allocation3 + $0x178] sm:$0xff] }
 0xb2d   : > { %v1522_v31 = vmul.f32 %v6113_v28, %v6109_v16  ;;  %v4995_v28 = vcombine.low %v1660_v20, %v1664_v21 }
 0xb2f   : > { %v1523_v33 = vpack.c.bf16 %v1522_v31, %v1522_v31  ;;  %v1666_v31 = vld [vmem:[#allocation3 + $0x78] sm:$0xff] }
 0xb30   : > { %v4999_v36 = vcombine.low %v1662_v30, %v1666_v31 }
 0xb31   : > { %5510 = vmatmul.mubr.msk.bf16.vlgmr.msra.gmra.mrb[20].mxu1 %vm1020_vm6, %v1523_v33  ;;  %v5000_v33 = vcombine.high %v1662_v30, %v1666_v31  ;;  %v5688_v30 = vld [vmem:[#allocation6 + $0x20] ss:$16 sps:$4 sm:$0xff]   ;;  %v5691_v31 = vld [vmem:[#allocation6 + $0x28] ss:$16 sps:$4 sm:$0xff]  }
 0xb32   : > { %1748 = vmatpush1.bf16.msra.mxu1 %v4985_v32  ;;  %1779 = vmatprep.mubr.bf16.mxu1 %v6288_v38  ;;  %v4991_v32 = vcombine.low %v1654_v26, %v1658_v27  ;;  %v5682_v26 = vld [vmem:[#allocation6] ss:$16 sps:$4 sm:$0xff]   ;;  %v5685_v27 = vld [vmem:[#allocation6 + $0x8] ss:$16 sps:$4 sm:$0xff]  }
 0xb33   : > { %1749 = vmatprep.subr.bf16.mxu1 %v4994_v34  ;;  %v1961_v34 = vld [vmem:[#allocation3 + $0x88] sm:$0xff] }
 0xb34   : > { %v5007_v42 = vcombine.low %v1961_v34, %v1965_v35 }
 0xb36   : > { %1750 = vmatpush1.bf16.msra.mxu1 %v4993_v37  ;;  %v5008_v37 = vcombine.high %v1961_v34, %v1965_v35  ;;  %v5697_v34 = vld [vmem:[#allocation6 + $0x48] ss:$16 sps:$4 sm:$0xff]   ;;  %v5702_v35 = vld [vmem:[#allocation6 + $0x64] ss:$16 sps:$4 sm:$0xff]  }
 0xb37   : > { %1829 = vmatprep.subr.bf16.mxu1 %v4990_v39  ;;  %v1969_v39 = vld [vmem:[#allocation3 + $0xc8] sm:$0xff] }
 0xb38   : > { %v5015_v48 = vcombine.low %v1969_v39, %v1973_v41 }
 0xb39   : > { %5001 = vmatmul.mubr.msk.bf16.vlgmr.msra.gmra.mrb[24].mxu1 %vm922_vm3, %v6581_v25 }
 0xb3a   : > { %1830 = vmatpush1.bf16.msra.mxu1 %v4989_v44  ;;  %1861 = vmatprep.mubr.bf16.mxu1 %v6288_v38  ;;  %v5016_v44 = vcombine.high %v1969_v39, %v1973_v41  ;;  %v5703_v39 = vld [vmem:[#allocation6 + $0x68] ss:$16 sps:$4 sm:$0xff]   ;;  %v5708_v41 = vld [vmem:[#allocation6 + $0x84] ss:$16 sps:$4 sm:$0xff]  }
 0xb3b   : > { %1831 = vmatprep.subr.bf16.mxu1 %v4998_v45  ;;  %v1963_v45 = vld [vmem:[#allocation3 + $0x98] sm:$0xff] }
 0xb3c   : > { %v5011_v52 = vcombine.low %v1963_v45, %v1967_v46 }
 0xb3e   : > { %1832 = vmatpush1.bf16.msra.mxu1 %v4997_v49  ;;  %v5012_v49 = vcombine.high %v1963_v45, %v1967_v46  ;;  %v5709_v45 = vld [vmem:[#allocation6 + $0x88] ss:$16 sps:$4 sm:$0xff]   ;;  %v5714_v46 = vld [vmem:[#allocation6 + $0xa4] ss:$16 sps:$4 sm:$0xff]  }
 0xb3f   : > { %2056 = vmatprep.subr.bf16.mxu1 %v5006_v50  ;;  %v1971_v50 = vld [vmem:[#allocation3 + $0xd8] sm:$0xff] }
 0xb40   : > { %v5019_v56 = vcombine.low %v1971_v50, %v1975_v51 }
 0xb41   : > { %5003 = vmatmul.mubr.msk.bf16.vlgmr.msra.gmra.mrb[28].mxu1 %vm922_vm3, %v6581_v25 }
 0xb42   : > { %2057 = vmatpush1.bf16.msra.mxu1 %v5005_v53  ;;  %2088 = vmatprep.mubr.bf16.mxu1 %v6288_v38  ;;  %v5020_v53 = vcombine.high %v1971_v50, %v1975_v51  ;;  %v5715_v50 = vld [vmem:[#allocation6 + $0xa8] ss:$16 sps:$4 sm:$0xff]   ;;  %v5720_v51 = vld [vmem:[#allocation6 + $0xc4] ss:$16 sps:$4 sm:$0xff]  }
 0xb43   : > { %2058 = vmatprep.subr.bf16.mxu1 %v5014_v54  ;;  %v2230_v54 = vld [vmem:[#allocation3 + $0x108] sm:$0xff] }
 0xb46   : > { %2059 = vmatpush1.bf16.msra.mxu1 %v5013_v57  ;;  %v5027_v57 = vcombine.low %v2230_v54, %v2234_v55 }
 0xb47   : > { %2138 = vmatprep.subr.bf16.mxu1 %v5010_v58  ;;  %v2237_v58 = vld [vmem:[#allocation3 + $0x140] sm:$0xff] }
 0xb49   : > { %5021 = vmatmul.mubr.msk.bf16.vlgmr.msra.gmra.mrb[24].mxu1 %vm922_vm3, %v6672_v40 }
 0xb4a   : > { %2139 = vmatpush1.bf16.msra.mxu1 %v5009_v61  ;;  %2170 = vmatprep.mubr.bf16.mxu1 %v6288_v38  ;;  %v5034_v61 = vcombine.high %v2237_v58, %v2241_v59 }
 0xb4b   : > { %2140 = vmatprep.subr.bf16.mxu1 %v5018_v62  ;;  %v2242_v62 = vld [vmem:[#allocation3 + $0x168] sm:$0xff] }
 0xb4c   : > { %v5035_v1 = vcombine.low %v2238_v60, %v2242_v62 }
 0xb4e   : > { %2141 = vmatpush1.bf16.msra.mxu1 %v5017_v63  ;;  %v5033_v63 = vcombine.low %v2237_v58, %v2241_v59  ;;  %v5732_v58 = vld [vmem:[#allocation6 + $0x104] ss:$16 sps:$4 sm:$0xff]   ;;  %v5735_v59 = vld [vmem:[#allocation6 + $0x10c] ss:$16 sps:$4 sm:$0xff]  }
 0xb4f   : > { %2328 = vmatprep.subr.bf16.mxu1 %v5026_v18 }
 0xb51   : > { %5023 = vmatmul.mubr.msk.bf16.vlgmr.msra.gmra.mrb[28].mxu1 %vm922_vm3, %v6672_v40 }
 0xb52   : > { %2360 = vmatprep.mubr.bf16.mxu1 %v6288_v38  ;;  %2329 = vmatpush1.bf16.msra.mxu1 %v5025_v43 }
 0xb53   : > { %2330 = vmatprep.subr.bf16.mxu1 %v5034_v61  ;;  %v5733_v61 = vld [vmem:[#allocation6 + $0x108] ss:$16 sps:$4 sm:$0xff]  }
 0xb56   : > { %2331 = vmatpush1.bf16.msra.mxu1 %v5033_v63  ;;  %v5741_v63 = vld [vmem:[#allocation6 + $0x12c] ss:$16 sps:$4 sm:$0xff]  }
 0xbfc   : > { %v1451_v2 = vpop.f32.mrb[16].mxu1 }
 0xbfd   : > { %v1452_v4 = vadd.f32 %v1451_v2, %v6681_v47  ;;  %v5499_v5 = vpop.f32.mrb[17].mxu1  ;;  %v5036_v2 = vcombine.high %v2238_v60, %v2242_v62  ;;  %v5730_v60 = vld [vmem:[#allocation6 + $0x100] ss:$16 sps:$4 sm:$0xff]   ;;  %v5738_v62 = vld [vmem:[#allocation6 + $0x124] ss:$16 sps:$4 sm:$0xff]  }
 0xbfe   : > { %v1454_v6 = vpop.f32.mrb[18].mxu1  ;;  %v2232_v5 = vld [vmem:[#allocation3 + $0x118] sm:$0xff] }
 0xbff   : > { %1457 = vst.msk [vmem:[#allocation2] sm:$0xff] %vm768_vm1, %v1452_v4  ;;  %v5500_v7 = vpop.f32.mrb[19].mxu1  ;;  %v2235_v4 = vld [vmem:[#allocation3 + $0x130] sm:$0xff] }
 0xc00   : > { %v5030_v6 = vcombine.high %v2231_v3, %v2235_v4  ;;  %v5029_v7 = vcombine.low %v2231_v3, %v2235_v4  ;;  %v5744_v3 = vld [vmem:[#allocation6 + $0x144] ss:$16 sps:$4 sm:$0xff]   ;;  %v5747_v4 = vld [vmem:[#allocation6 + $0x14c] ss:$16 sps:$4 sm:$0xff]  }
 0xc02   : > { %2410 = vmatprep.subr.bf16.mxu1 %v5030_v6  ;;  %v5745_v6 = vld [vmem:[#allocation6 + $0x148] ss:$16 sps:$4 sm:$0xff]  }
 0xc04   : > { %v1570_v12 = vpop.f32.mrb[20].mxu1 }
 0xc05   : > { %v1571_v14 = vadd.f32 %v1570_v12, %v1528_v11  ;;  %v5511_v15 = vpop.f32.mrb[21].mxu1 }
 0xc06   : > { %v1573_v16 = vpop.f32.mrb[22].mxu1 }
 0xc07   : > { %1577 = vrot.lane.b32.xlu1 %v1571_v14, %s7105_s22  ;;  %v5512_v47 = vpop.f32.mrb[23].mxu1  ;;  %v2239_v14 = vld [vmem:[#allocation3 + $0x150] sm:$0xff]  ;;  %s6170_s22 = scalar_lea.vmem %s6925_s3, 256 }
 0xc08   : > { %v2243_v16 = vld [vmem:[#allocation3 + $0x170] sm:$0xff]  ;;  %v2240_v47 = vld [vmem:[#allocation3 + $0x158] sm:$0xff]  ;;  %p6171_p12 = scmp.ne.s32.totalorder %s6925_s3, %s6170_s22  ;;  %p6178_p7 = scmp.lt.s32.totalorder %s6176_s2, %s6170_s22 }
 0xc09   : > { %v5040_v20 = vcombine.high %v2240_v47, %v2244_v17  ;;  %v5037_v21 = vcombine.low %v2239_v14, %v2243_v16 }
 0xc0a   : > { %p6172_p2 = pnand %p6171_p12, %p7106_p1  ;;  %p6179_p8 = por %p6178_p7, %p6177_p4 }
 0xc0c   : > { %p6173_p3 = pneg %p6172_p2 }
 0xc0e   : > { %p6180_p11 = pnand %p6179_p8, %p6173_p3 }
 0xc79   : > { %v1578_v19 = vpop.permute.xlu1 %1577 }
 0xc7a   : > { %1580 = vst.msk [vmem:[#allocation2] sm:$0xff] %vm1205_vm7, %v1578_v19  ;;  %v5038_v19 = vcombine.high %v2239_v14, %v2243_v16  ;;  %v5762_v14 = vld [vmem:[#allocation6 + $0x1a4] ss:$16 sps:$4 sm:$0xff]   ;;  %v5760_v16 = vld [vmem:[#allocation6 + $0x1a0] ss:$16 sps:$4 sm:$0xff]  }
 0xc81   : > { %v1581_v22 = vld [vmem:[#allocation2] sm:$0xff] }
 0xc82   : > { %v1582_v23 = vpack.c.bf16 %v1581_v22, %v1581_v22  ;;  %v5039_v22 = vcombine.low %v2240_v47, %v2244_v17  ;;  %v5763_v47 = vld [vmem:[#allocation6 + $0x1a8] ss:$16 sps:$4 sm:$0xff]   ;;  %v5768_v17 = vld [vmem:[#allocation6 + $0x1c4] ss:$16 sps:$4 sm:$0xff]  }
 0xc84   : > { %5518 = vmatmul.mubr.msk.bf16.vlgmr.msra.gmra.mrb[28].mxu0 %vm922_vm3, %v1582_v23  ;;  %v5684_v23 = vld [vmem:[#allocation6 + $0x4] ss:$16 sps:$4 sm:$0xff]  }
 0xc85   : > { %1789 = vmatpush1.bf16.msra.mxu0 %v4987_v13  ;;  %1820 = vmatprep.mubr.bf16.mxu0 %v6288_v38 }
 0xc86   : > { %1790 = vmatprep.subr.bf16.mxu0 %v4996_v24  ;;  %v5687_v24 = vld [vmem:[#allocation6 + $0xc] ss:$16 sps:$4 sm:$0xff]  }
 0xc89   : > { %1791 = vmatpush1.bf16.msra.mxu0 %v4995_v28  ;;  %v5690_v28 = vld [vmem:[#allocation6 + $0x24] ss:$16 sps:$4 sm:$0xff]  }
 0xc8a   : > { %1870 = vmatprep.subr.bf16.mxu0 %v4992_v29  ;;  %v5693_v29 = vld [vmem:[#allocation6 + $0x2c] ss:$16 sps:$4 sm:$0xff]  }
 0xc8c   : > { %5002 = vmatmul.mubr.msk.bf16.vlgmr.msra.gmra.mrb[32].mxu0 %vm922_vm3, %v6581_v25 }
 0xc8d   : > { %1871 = vmatpush1.bf16.msra.mxu0 %v4991_v32  ;;  %1902 = vmatprep.mubr.bf16.mxu0 %v6288_v38  ;;  %v5696_v32 = vld [vmem:[#allocation6 + $0x44] ss:$16 sps:$4 sm:$0xff]  }
 0xc8e   : > { %1872 = vmatprep.subr.bf16.mxu0 %v5000_v33  ;;  %v5694_v33 = vld [vmem:[#allocation6 + $0x40] ss:$16 sps:$4 sm:$0xff]  }
 0xc91   : > { %1873 = vmatpush1.bf16.msra.mxu0 %v4999_v36  ;;  %v5705_v36 = vld [vmem:[#allocation6 + $0x6c] ss:$16 sps:$4 sm:$0xff]  }
 0xc92   : > { %2097 = vmatprep.subr.bf16.mxu0 %v5008_v37  ;;  %v5700_v37 = vld [vmem:[#allocation6 + $0x60] ss:$16 sps:$4 sm:$0xff]  }
 0xc94   : > { %5004 = vmatmul.mubr.msk.bf16.vlgmr.msra.gmra.mrb[36].mxu0 %vm922_vm3, %v6581_v25  ;;  %v5028_v25 = vcombine.high %v2230_v54, %v2234_v55  ;;  %v5721_v54 = vld [vmem:[#allocation6 + $0xc8] ss:$16 sps:$4 sm:$0xff]   ;;  %v5726_v55 = vld [vmem:[#allocation6 + $0xe4] ss:$16 sps:$4 sm:$0xff]  }
 0xc95   : > { %2098 = vmatpush1.bf16.msra.mxu0 %v5007_v42  ;;  %2129 = vmatprep.mubr.bf16.mxu0 %v6288_v38  ;;  %v5711_v42 = vld [vmem:[#allocation6 + $0x8c] ss:$16 sps:$4 sm:$0xff]  }
 0xc96   : > { %2099 = vmatprep.subr.bf16.mxu0 %v5016_v44  ;;  %v5706_v44 = vld [vmem:[#allocation6 + $0x80] ss:$16 sps:$4 sm:$0xff]  }
 0xc99   : > { %2100 = vmatpush1.bf16.msra.mxu0 %v5015_v48  ;;  %v5717_v48 = vld [vmem:[#allocation6 + $0xac] ss:$16 sps:$4 sm:$0xff]  }
 0xc9a   : > { %2179 = vmatprep.subr.bf16.mxu0 %v5012_v49  ;;  %v5712_v49 = vld [vmem:[#allocation6 + $0xa0] ss:$16 sps:$4 sm:$0xff]  }
 0xc9c   : > { %5022 = vmatmul.mubr.msk.bf16.vlgmr.msra.gmra.mrb[32].mxu0 %vm922_vm3, %v6672_v40 }
 0xc9d   : > { %2180 = vmatpush1.bf16.msra.mxu0 %v5011_v52  ;;  %2211 = vmatprep.mubr.bf16.mxu0 %v6288_v38  ;;  %v5723_v52 = vld [vmem:[#allocation6 + $0xcc] ss:$16 sps:$4 sm:$0xff]  }
 0xc9e   : > { %2181 = vmatprep.subr.bf16.mxu0 %v5020_v53  ;;  %v5718_v53 = vld [vmem:[#allocation6 + $0xc0] ss:$16 sps:$4 sm:$0xff]  }
 0xca1   : > { %2182 = vmatpush1.bf16.msra.mxu0 %v5019_v56  ;;  %v5729_v56 = vld [vmem:[#allocation6 + $0xec] ss:$16 sps:$4 sm:$0xff]  }
 0xca2   : > { %2369 = vmatprep.subr.bf16.mxu0 %v5028_v25  ;;  %v5724_v25 = vld [vmem:[#allocation6 + $0xe0] ss:$16 sps:$4 sm:$0xff]  }
 0xca4   : > { %5024 = vmatmul.mubr.msk.bf16.vlgmr.msra.gmra.mrb[36].mxu0 %vm922_vm3, %v6672_v40  ;;  %v2236_v40 = vld [vmem:[#allocation3 + $0x138] sm:$0xff] }
 0xca5   : > { %2370 = vmatpush1.bf16.msra.mxu0 %v5027_v57  ;;  %2401 = vmatprep.mubr.bf16.mxu0 %v6288_v38  ;;  %v5031_v8 = vcombine.low %v2232_v5, %v2236_v40  ;;  %v5032_v9 = vcombine.high %v2232_v5, %v2236_v40  ;;  %v5727_v57 = vld [vmem:[#allocation6 + $0xe8] ss:$16 sps:$4 sm:$0xff]   ;;  %v5742_v5 = vld [vmem:[#allocation6 + $0x140] ss:$16 sps:$4 sm:$0xff]   ;;  %v5750_v40 = vld [vmem:[#allocation6 + $0x164] ss:$16 sps:$4 sm:$0xff]  }
 0xca6   : > { %2371 = vmatprep.subr.bf16.mxu0 %v5036_v2  ;;  %v5739_v2 = vld [vmem:[#allocation6 + $0x128] ss:$16 sps:$4 sm:$0xff]  }
 0xca9   : > { %2372 = vmatpush1.bf16.msra.mxu0 %v5035_v1  ;;  %v5736_v1 = vld [vmem:[#allocation6 + $0x120] ss:$16 sps:$4 sm:$0xff]  }
 0xcaa   : > { %2451 = vmatprep.subr.bf16.mxu0 %v5032_v9  ;;  %v5751_v9 = vld [vmem:[#allocation6 + $0x168] ss:$16 sps:$4 sm:$0xff]  }
 0xd57   : > { %v1643_v11 = vpop.f32.mrb[28].mxu0 }
 0xd58   : > { %v1644_v12 = vadd.f32 %v4981_v10, %v1643_v11  ;;  %v5519_v13 = vpop.f32.mrb[29].mxu0  ;;  %v5756_v10 = vld [vmem:[#allocation6 + $0x184] ss:$16 sps:$4 sm:$0xff]   ;;  %v5759_v11 = vld [vmem:[#allocation6 + $0x18c] ss:$16 sps:$4 sm:$0xff]  }
 0xd59   : > { %v1646_v15 = vpop.f32.mrb[30].mxu0  ;;  %v5757_v13 = vld [vmem:[#allocation6 + $0x188] ss:$16 sps:$4 sm:$0xff]  }
 0xd5a   : > { %v1649_v0 = vmax.f32 %v1644_v12, 0.0  ;;  %v5520_v43 = vpop.f32.mrb[31].mxu0  ;;  %v5754_v12 = vld [vmem:[#allocation6 + $0x180] ss:$16 sps:$4 sm:$0xff]   ;;  %v5765_v15 = vld [vmem:[#allocation6 + $0x1ac] ss:$16 sps:$4 sm:$0xff]  }
 0xd5b   : > { %v5766_v43 = vld [vmem:[#allocation6 + $0x1c0] ss:$16 sps:$4 sm:$0xff]  }
 0xd5c   : > { %v2228_v18 = vpack.c.bf16 %v1649_v0, %v1649_v0  ;;  %v5771_v0 = vld [vmem:[#allocation6 + $0x1cc] ss:$16 sps:$4 sm:$0xff]  }
 0xd5e   : > { %5041 = vmatmul.mubr.msk.bf16.vlgmr.msra.gmra.mrb[24].mxu1 %vm922_vm3, %v2228_v18  ;;  %5042 = vmatmul.mubr.msk.bf16.vlgmr.msra.gmra.mrb[32].mxu0 %vm922_vm3, %v2228_v18 }
 0xd5f   : > { %2411 = vmatpush1.bf16.msra.mxu1 %v5029_v7  ;;  %2452 = vmatpush1.bf16.msra.mxu0 %v5031_v8  ;;  %v5753_v7 = vld [vmem:[#allocation6 + $0x16c] ss:$16 sps:$4 sm:$0xff]   ;;  %v5748_v8 = vld [vmem:[#allocation6 + $0x160] ss:$16 sps:$4 sm:$0xff]  }
 0xd60   : > { %2412 = vmatprep.subr.bf16.mxu1 %v5038_v19  ;;  %2453 = vmatprep.subr.bf16.mxu0 %v5040_v20  ;;  %v5774_v19 = vld [vmem:[#allocation6 + $0x1e4] ss:$16 sps:$4 sm:$0xff]   ;;  %v5777_v20 = vld [vmem:[#allocation6 + $0x1ec] ss:$16 sps:$4 sm:$0xff]  }
 0xd61   : > { %2442 = vmatprep.mubr.bf16.mxu1 %v6288_v38  ;;  %2483 = vmatprep.mubr.bf16.mxu0 %v6288_v38  ;;  %v5699_v38 = vld [vmem:[#allocation6 + $0x4c] ss:$16 sps:$4 sm:$0xff]  }
 0xd63   : > { %2413 = vmatpush1.bf16.msra.mxu1 %v5037_v21  ;;  %2454 = vmatpush1.bf16.msra.mxu0 %v5039_v22  ;;  %v5772_v21 = vld [vmem:[#allocation6 + $0x1e0] ss:$16 sps:$4 sm:$0xff]   ;;  %v5775_v22 = vld [vmem:[#allocation6 + $0x1e8] ss:$16 sps:$4 sm:$0xff]  }
 0xd64   : > { %4066 = vmatprep.subr.bf16.mxu1 %v5684_v23  ;;  %4230 = vmatprep.subr.bf16.mxu0 %v5687_v24  ;;  %v5780_v23 = vld [vmem:[#allocation6 + $0x204] ss:$16 sps:$4 sm:$0xff]   ;;  %v5783_v24 = vld [vmem:[#allocation6 + $0x20c] ss:$16 sps:$4 sm:$0xff]  }
 0xd66   : > { %5043 = vmatmul.mubr.msk.bf16.vlgmr.msra.gmra.mrb[28].mxu1 %vm922_vm3, %v2228_v18  ;;  %5044 = vmatmul.mubr.msk.bf16.vlgmr.msra.gmra.mrb[36].mxu0 %vm922_vm3, %v2228_v18  ;;  %v5769_v18 = vld [vmem:[#allocation6 + $0x1c8] ss:$16 sps:$4 sm:$0xff]  }
 0xd67   : > { %4067 = vmatpush1.bf16.msra.mxu1 %v5682_v26  ;;  %4231 = vmatpush1.bf16.msra.mxu0 %v5685_v27  ;;  %v1912_v26 = vlaneseq }
 0xd68   : > { %4068 = vmatprep.subr.bf16.mxu1 %v5690_v28  ;;  %4232 = vmatprep.subr.bf16.mxu0 %v5693_v29  ;;  %v6776_v29 = vld [vmem:[%s7037_s15] sm:$0xff] }
 0xd69   : > { %v6770_v27 = vshrl.u32 %v1912_v26, 7  ;;  %v5829_v26 = vld [vmem:[#allocation6 + $0x308] ss:$16 sps:$4 sm:$0xff]  }
 0xd6b   : > { %4069 = vmatpush1.bf16.msra.mxu1 %v5688_v30  ;;  %4233 = vmatpush1.bf16.msra.mxu0 %v5691_v31  ;;  %v1914_v28 = vsub.s32 0, %v6770_v27  ;;  %v1918_v30 = vsub.s32 1, %v6770_v27  ;;  %v1926_v31 = vsub.s32 3, %v6770_v27 }
 0xd6c   : > { %4070 = vmatprep.subr.bf16.mxu1 %v5696_v32  ;;  %4234 = vmatprep.subr.bf16.mxu0 %v5699_v38 }
 0xd6d   : > { %v1915_v32 = vrot.slane %v6776_v29, %v1914_v28  ;;  %v1919_v38 = vrot.slane %v6776_v29, %v1918_v30 }
 0xd6f   : > { %4071 = vmatpush1.bf16.msra.mxu1 %v5694_v33  ;;  %4235 = vmatpush1.bf16.msra.mxu0 %v5697_v34  ;;  %v1927_v33 = vrot.slane %v6776_v29, %v1926_v31 }
 0xd70   : > { %4072 = vmatprep.subr.bf16.mxu1 %v5702_v35  ;;  %4236 = vmatprep.subr.bf16.mxu0 %v5705_v36 }
 0xd73   : > { %4073 = vmatpush1.bf16.msra.mxu1 %v5700_v37  ;;  %4237 = vmatpush1.bf16.msra.mxu0 %v5703_v39 }
 0xd74   : > { %4074 = vmatprep.subr.bf16.mxu1 %v5708_v41  ;;  %4238 = vmatprep.subr.bf16.mxu0 %v5711_v42 }
 0xd77   : > { %4075 = vmatpush1.bf16.msra.mxu1 %v5706_v44  ;;  %4239 = vmatpush1.bf16.msra.mxu0 %v5709_v45 }
 0xd78   : > { %4076 = vmatprep.subr.bf16.mxu1 %v5714_v46  ;;  %4240 = vmatprep.subr.bf16.mxu0 %v5717_v48 }
 0xd7b   : > { %4077 = vmatpush1.bf16.msra.mxu1 %v5712_v49  ;;  %4241 = vmatpush1.bf16.msra.mxu0 %v5715_v50  ;;  %v5778_v50 = vld [vmem:[#allocation6 + $0x200] ss:$16 sps:$4 sm:$0xff]  }
 0xd7c   : > { %4078 = vmatprep.subr.bf16.mxu1 %v5720_v51  ;;  %4242 = vmatprep.subr.bf16.mxu0 %v5723_v52  ;;  %v5781_v51 = vld [vmem:[#allocation6 + $0x208] ss:$16 sps:$4 sm:$0xff]  }
 0xd7f   : > { %4079 = vmatpush1.bf16.msra.mxu1 %v5718_v53  ;;  %4243 = vmatpush1.bf16.msra.mxu0 %v5721_v54  ;;  %v5786_v53 = vld [vmem:[#allocation6 + $0x224] ss:$16 sps:$4 sm:$0xff]   ;;  %v5789_v54 = vld [vmem:[#allocation6 + $0x22c] ss:$16 sps:$4 sm:$0xff]  }
 0xd80   : > { %4080 = vmatprep.subr.bf16.mxu1 %v5726_v55  ;;  %4244 = vmatprep.subr.bf16.mxu0 %v5729_v56 }
 0xd83   : > { %4081 = vmatpush1.bf16.msra.mxu1 %v5724_v25  ;;  %4245 = vmatpush1.bf16.msra.mxu0 %v5727_v57  ;;  %v5784_v57 = vld [vmem:[#allocation6 + $0x220] ss:$16 sps:$4 sm:$0xff]  }
 0xd84   : > { %4082 = vmatprep.subr.bf16.mxu1 %v5732_v58  ;;  %4246 = vmatprep.subr.bf16.mxu0 %v5735_v59  ;;  %v5787_v58 = vld [vmem:[#allocation6 + $0x228] ss:$16 sps:$4 sm:$0xff]  }
 0xd87   : > { %4083 = vmatpush1.bf16.msra.mxu1 %v5730_v60  ;;  %4247 = vmatpush1.bf16.msra.mxu0 %v5733_v61  ;;  %v5792_v61 = vld [vmem:[#allocation6 + $0x244] ss:$16 sps:$4 sm:$0xff]  }
 0xd88   : > { %4084 = vmatprep.subr.bf16.mxu1 %v5738_v62  ;;  %4248 = vmatprep.subr.bf16.mxu0 %v5741_v63  ;;  %v5795_v62 = vld [vmem:[#allocation6 + $0x24c] ss:$16 sps:$4 sm:$0xff]  }
 0xd8b   : > { %4085 = vmatpush1.bf16.msra.mxu1 %v5736_v1  ;;  %4249 = vmatpush1.bf16.msra.mxu0 %v5739_v2 }
 0xd8c   : > { %4086 = vmatprep.subr.bf16.mxu1 %v5744_v3  ;;  %4250 = vmatprep.subr.bf16.mxu0 %v5747_v4  ;;  %v5790_v4 = vld [vmem:[#allocation6 + $0x240] ss:$16 sps:$4 sm:$0xff]  }
 0xd8f   : > { %4087 = vmatpush1.bf16.msra.mxu1 %v5742_v5  ;;  %4251 = vmatpush1.bf16.msra.mxu0 %v5745_v6  ;;  %v5793_v5 = vld [vmem:[#allocation6 + $0x248] ss:$16 sps:$4 sm:$0xff]   ;;  %v5798_v6 = vld [vmem:[#allocation6 + $0x264] ss:$16 sps:$4 sm:$0xff]  }
 0xd90   : > { %4088 = vmatprep.subr.bf16.mxu1 %v5750_v40  ;;  %4252 = vmatprep.subr.bf16.mxu0 %v5753_v7  ;;  %v5801_v40 = vld [vmem:[#allocation6 + $0x26c] ss:$16 sps:$4 sm:$0xff]   ;;  %v5796_v7 = vld [vmem:[#allocation6 + $0x260] ss:$16 sps:$4 sm:$0xff]  }
 0xd93   : > { %4089 = vmatpush1.bf16.msra.mxu1 %v5748_v8  ;;  %4253 = vmatpush1.bf16.msra.mxu0 %v5751_v9  ;;  %v5799_v8 = vld [vmem:[#allocation6 + $0x268] ss:$16 sps:$4 sm:$0xff]   ;;  %v5804_v9 = vld [vmem:[#allocation6 + $0x284] ss:$16 sps:$4 sm:$0xff]  }
 0xd94   : > { %4090 = vmatprep.subr.bf16.mxu1 %v5756_v10  ;;  %4254 = vmatprep.subr.bf16.mxu0 %v5759_v11  ;;  %v5807_v10 = vld [vmem:[#allocation6 + $0x28c] ss:$16 sps:$4 sm:$0xff]   ;;  %v5802_v11 = vld [vmem:[#allocation6 + $0x280] ss:$16 sps:$4 sm:$0xff]  }
 0xd97   : > { %4091 = vmatpush1.bf16.msra.mxu1 %v5754_v12  ;;  %4255 = vmatpush1.bf16.msra.mxu0 %v5757_v13  ;;  %v5805_v12 = vld [vmem:[#allocation6 + $0x288] ss:$16 sps:$4 sm:$0xff]   ;;  %v5810_v13 = vld [vmem:[#allocation6 + $0x2a4] ss:$16 sps:$4 sm:$0xff]  }
 0xd98   : > { %4092 = vmatprep.subr.bf16.mxu1 %v5762_v14  ;;  %4256 = vmatprep.subr.bf16.mxu0 %v5765_v15  ;;  %v5813_v14 = vld [vmem:[#allocation6 + $0x2ac] ss:$16 sps:$4 sm:$0xff]   ;;  %v5808_v15 = vld [vmem:[#allocation6 + $0x2a0] ss:$16 sps:$4 sm:$0xff]  }
 0xd9b   : > { %4093 = vmatpush1.bf16.msra.mxu1 %v5760_v16  ;;  %4257 = vmatpush1.bf16.msra.mxu0 %v5763_v47  ;;  %v5811_v16 = vld [vmem:[#allocation6 + $0x2a8] ss:$16 sps:$4 sm:$0xff]   ;;  %v5816_v47 = vld [vmem:[#allocation6 + $0x2c4] ss:$16 sps:$4 sm:$0xff]  }
 0xd9c   : > { %4094 = vmatprep.subr.bf16.mxu1 %v5768_v17  ;;  %4258 = vmatprep.subr.bf16.mxu0 %v5771_v0  ;;  %v5819_v17 = vld [vmem:[#allocation6 + $0x2cc] ss:$16 sps:$4 sm:$0xff]   ;;  %v5814_v0 = vld [vmem:[#allocation6 + $0x2c0] ss:$16 sps:$4 sm:$0xff]  }
 0xd9f   : > { %4095 = vmatpush1.bf16.msra.mxu1 %v5766_v43  ;;  %4259 = vmatpush1.bf16.msra.mxu0 %v5769_v18  ;;  %v5817_v43 = vld [vmem:[#allocation6 + $0x2c8] ss:$16 sps:$4 sm:$0xff]   ;;  %v5822_v18 = vld [vmem:[#allocation6 + $0x2e4] ss:$16 sps:$4 sm:$0xff]  }
 0xda0   : > { %4096 = vmatprep.subr.bf16.mxu1 %v5774_v19  ;;  %4260 = vmatprep.subr.bf16.mxu0 %v5777_v20  ;;  %v5825_v19 = vld [vmem:[#allocation6 + $0x2ec] ss:$16 sps:$4 sm:$0xff]   ;;  %v5820_v20 = vld [vmem:[#allocation6 + $0x2e0] ss:$16 sps:$4 sm:$0xff]  }
 0xda3   : > { %4097 = vmatpush1.bf16.msra.mxu1 %v5772_v21  ;;  %4261 = vmatpush1.bf16.msra.mxu0 %v5775_v22  ;;  %v5823_v21 = vld [vmem:[#allocation6 + $0x2e8] ss:$16 sps:$4 sm:$0xff]   ;;  %v5828_v22 = vld [vmem:[#allocation6 + $0x304] ss:$16 sps:$4 sm:$0xff]  }
 0xda4   : > { %4107 = vmatprep.subr.bf16.mxu1 %v5780_v23  ;;  %4271 = vmatprep.subr.bf16.mxu0 %v5783_v24  ;;  %v5831_v23 = vld [vmem:[#allocation6 + $0x30c] ss:$16 sps:$4 sm:$0xff]   ;;  %v5826_v24 = vld [vmem:[#allocation6 + $0x300] ss:$16 sps:$4 sm:$0xff]  }
 0xe31   : > { %v2362_v34 = vpop.f32.mrb[24].mxu1  ;;  %v6789_v35 = vpop.f32.mrb[32].mxu0 }
 0xe32   : > { %v5521_v36 = vadd.f32 %v2362_v34, %v1915_v32  ;;  %v2364_v37 = vpop.f32.mrb[25].mxu1  ;;  %v2405_v39 = vpop.f32.mrb[33].mxu0  ;;  %v5834_v32 = vld [vmem:[#allocation6 + $0x324] ss:$16 sps:$4 sm:$0xff]   ;;  %v5835_v34 = vld [vmem:[#allocation6 + $0x328] ss:$16 sps:$4 sm:$0xff]  }
 0xe33   : > { %v5522_v41 = vadd.f32 %v2364_v37, %v1919_v38  ;;  %v2366_v42 = vpop.f32.mrb[26].mxu1  ;;  %v2407_v44 = vpop.f32.mrb[34].mxu0  ;;  %v5524_v45 = vadd.f32 %v2405_v39, %v1927_v33  ;;  %v5837_v38 = vld [vmem:[#allocation6 + $0x32c] ss:$16 sps:$4 sm:$0xff]   ;;  %v5832_v33 = vld [vmem:[#allocation6 + $0x320] ss:$16 sps:$4 sm:$0xff]  }
 0xe34   : > { %v2367_v46 = vpop.f32.mrb[27].mxu1  ;;  %v2408_v48 = vpop.f32.mrb[35].mxu0  ;;  %v2500_v52 = vpack.c.bf16 %v5521_v36, %v5521_v36  ;;  %v5840_v36 = vld [vmem:[#allocation6 + $0x344] ss:$16 sps:$4 sm:$0xff]   ;;  %v5843_v37 = vld [vmem:[#allocation6 + $0x34c] ss:$16 sps:$4 sm:$0xff]  }
 0xe35   : > { %v2501_v49 = vpack.c.bf16 %v5522_v41, %v5522_v41  ;;  %v2503_v55 = vpack.c.bf16 %v5524_v45, %v5524_v45  ;;  %v5838_v39 = vld [vmem:[#allocation6 + $0x340] ss:$16 sps:$4 sm:$0xff]   ;;  %v5841_v41 = vld [vmem:[#allocation6 + $0x348] ss:$16 sps:$4 sm:$0xff]   ;;  %v5846_v42 = vld [vmem:[#allocation6 + $0x364] ss:$16 sps:$4 sm:$0xff]  }
 0xe36   : > { %v5849_v44 = vld [vmem:[#allocation6 + $0x36c] ss:$16 sps:$4 sm:$0xff]   ;;  %v5844_v45 = vld [vmem:[#allocation6 + $0x360] ss:$16 sps:$4 sm:$0xff]   ;;  %v5847_v46 = vld [vmem:[#allocation6 + $0x368] ss:$16 sps:$4 sm:$0xff]  }
 0xe37   : > { %4098 = vmatprep.mubr.bf16.mxu1 %v2501_v49  ;;  %4262 = vmatprep.mubr.bf16.mxu0 %v2501_v49  ;;  %v5852_v48 = vld [vmem:[#allocation6 + $0x384] ss:$16 sps:$4 sm:$0xff]   ;;  %v5855_v49 = vld [vmem:[#allocation6 + $0x38c] ss:$16 sps:$4 sm:$0xff]  }
 0xe38   : > { %4099 = vmatmul.mubr.bf16.vlgmr.msra.gmra.mrb[32].mxu1 %v2500_v52  ;;  %4263 = vmatmul.mubr.bf16.vlgmr.msra.gmra.mrb[40].mxu0 %v2500_v52  ;;  %v5858_v52 = vld [vmem:[#allocation6 + $0x3a4] ss:$16 sps:$4 sm:$0xff]  }
 0xe39   : > { %4108 = vmatpush1.bf16.msra.mxu1 %v5778_v50  ;;  %4272 = vmatpush1.bf16.msra.mxu0 %v5781_v51  ;;  %v6791_v56 = vpop.f32.mrb[28].mxu1  ;;  %v6793_v25 = vpop.f32.mrb[36].mxu0  ;;  %v5850_v50 = vld [vmem:[#allocation6 + $0x380] ss:$16 sps:$4 sm:$0xff]   ;;  %v5853_v51 = vld [vmem:[#allocation6 + $0x388] ss:$16 sps:$4 sm:$0xff]  }
 0xe3a   : > { %4139 = vmatprep.mubr.bf16.mxu1 %v2503_v55  ;;  %4303 = vmatprep.mubr.bf16.mxu0 %v2503_v55  ;;  %v6795_v59 = vpop.f32.mrb[29].mxu1  ;;  %v6797_v60 = vpop.f32.mrb[37].mxu0  ;;  %v5859_v55 = vld [vmem:[#allocation6 + $0x3a8] ss:$16 sps:$4 sm:$0xff]  }
 0xe3b   : > { %v2448_v63 = vpop.f32.mrb[30].mxu1  ;;  %v2489_v1 = vpop.f32.mrb[38].mxu0  ;;  %4109 = vmatprep.subr.bf16.mxu1 %v5786_v53  ;;  %4273 = vmatprep.subr.bf16.mxu0 %v5789_v54  ;;  %v5861_v53 = vld [vmem:[#allocation6 + $0x3ac] ss:$16 sps:$4 sm:$0xff]   ;;  %v5856_v54 = vld [vmem:[#allocation6 + $0x3a0] ss:$16 sps:$4 sm:$0xff]  }
 0xe3c   : > { %v2449_v2 = vpop.f32.mrb[31].mxu1  ;;  %v2490_v3 = vpop.f32.mrb[39].mxu0  ;;  %v5862_v63 = vld [vmem:[#allocation6 + $0x3c0] ss:$16 sps:$4 sm:$0xff]   ;;  %v5865_v1 = vld [vmem:[#allocation6 + $0x3c8] ss:$16 sps:$4 sm:$0xff]  }
 0xe3d   : > { %4110 = vmatpush1.bf16.msra.mxu1 %v5784_v57  ;;  %4274 = vmatpush1.bf16.msra.mxu0 %v5787_v58  ;;  %v1922_v57 = vsub.s32 2, %v6770_v27  ;;  %v5864_v58 = vld [vmem:[#allocation6 + $0x3c4] ss:$16 sps:$4 sm:$0xff]  }
 0xe3e   : > { %4111 = vmatprep.subr.bf16.mxu1 %v5792_v61  ;;  %4275 = vmatprep.subr.bf16.mxu0 %v5795_v62  ;;  %v5867_v61 = vld [vmem:[#allocation6 + $0x3cc] ss:$16 sps:$4 sm:$0xff]   ;;  %v1934_v62 = vsub.s32 5, %v6770_v27  ;;  %v5870_v3 = vld [vmem:[#allocation6 + $0x3e4] ss:$16 sps:$4 sm:$0xff]  }
 0xe3f   : > { %v1923_v2 = vrot.slane %v6776_v29, %v1922_v57 }
 0xe41   : > { %4112 = vmatpush1.bf16.msra.mxu1 %v5790_v4  ;;  %4276 = vmatpush1.bf16.msra.mxu0 %v5793_v5  ;;  %v5873_v4 = vld [vmem:[#allocation6 + $0x3ec] ss:$16 sps:$4 sm:$0xff]   ;;  %v1935_v5 = vrot.slane %v6776_v29, %v1934_v62  ;;  %v5934_v62 = vld [vmem:[#allocation6 + $0x540] ss:$16 sps:$4 sm:$0xff]  }
 0xe42   : > { %4113 = vmatprep.subr.bf16.mxu1 %v5798_v6  ;;  %4277 = vmatprep.subr.bf16.mxu0 %v5801_v40  ;;  %v5868_v6 = vld [vmem:[#allocation6 + $0x3e0] ss:$16 sps:$4 sm:$0xff]   ;;  %v5871_v40 = vld [vmem:[#allocation6 + $0x3e8] ss:$16 sps:$4 sm:$0xff]  }
 0xe45   : > { %4114 = vmatpush1.bf16.msra.mxu1 %v5796_v7  ;;  %4278 = vmatpush1.bf16.msra.mxu0 %v5799_v8  ;;  %v5523_v7 = vadd.f32 %v6789_v35, %v1923_v2  ;;  %v5876_v8 = vld [vmem:[#allocation6 + $0x404] ss:$16 sps:$4 sm:$0xff]   ;;  %v5880_v35 = vld [vmem:[#allocation6 + $0x420] ss:$16 sps:$4 sm:$0xff]   ;;  %v5945_v2 = vld [vmem:[#allocation6 + $0x56c] ss:$16 sps:$4 sm:$0xff]  }
 0xe46   : > { %4115 = vmatprep.subr.bf16.mxu1 %v5804_v9  ;;  %4279 = vmatprep.subr.bf16.mxu0 %v5807_v10  ;;  %v5879_v9 = vld [vmem:[#allocation6 + $0x40c] ss:$16 sps:$4 sm:$0xff]   ;;  %v5526_v10 = vadd.f32 %v6795_v59, %v1935_v5  ;;  %v5948_v5 = vld [vmem:[#allocation6 + $0x584] ss:$16 sps:$4 sm:$0xff]  }
 0xe47   : > { %v5891_v59 = vld [vmem:[#allocation6 + $0x44c] ss:$16 sps:$4 sm:$0xff]  }
 0xe49   : > { %4116 = vmatpush1.bf16.msra.mxu1 %v5802_v11  ;;  %4280 = vmatpush1.bf16.msra.mxu0 %v5805_v12  ;;  %v5874_v11 = vld [vmem:[#allocation6 + $0x400] ss:$16 sps:$4 sm:$0xff]   ;;  %v2502_v12 = vpack.c.bf16 %v5523_v7, %v5523_v7  ;;  %v5949_v7 = vld [vmem:[#allocation6 + $0x588] ss:$16 sps:$4 sm:$0xff]  }
 0xe4a   : > { %4117 = vmatprep.subr.bf16.mxu1 %v5810_v13  ;;  %4281 = vmatprep.subr.bf16.mxu0 %v5813_v14  ;;  %v5877_v13 = vld [vmem:[#allocation6 + $0x408] ss:$16 sps:$4 sm:$0xff]   ;;  %v2505_v14 = vpack.c.bf16 %v5526_v10, %v5526_v10  ;;  %v5952_v10 = vld [vmem:[#allocation6 + $0x5a0] ss:$16 sps:$4 sm:$0xff]  }
 0xe4d   : > { %4118 = vmatpush1.bf16.msra.mxu1 %v5808_v15  ;;  %4282 = vmatpush1.bf16.msra.mxu0 %v5811_v16  ;;  %v5882_v15 = vld [vmem:[#allocation6 + $0x424] ss:$16 sps:$4 sm:$0xff]   ;;  %v5885_v16 = vld [vmem:[#allocation6 + $0x42c] ss:$16 sps:$4 sm:$0xff]  }
 0xe4e   : > { %4119 = vmatprep.subr.bf16.mxu1 %v5816_v47  ;;  %4283 = vmatprep.subr.bf16.mxu0 %v5819_v17  ;;  %v5883_v47 = vld [vmem:[#allocation6 + $0x428] ss:$16 sps:$4 sm:$0xff]   ;;  %v5888_v17 = vld [vmem:[#allocation6 + $0x444] ss:$16 sps:$4 sm:$0xff]  }
 0xe51   : > { %4120 = vmatpush1.bf16.msra.mxu1 %v5814_v0  ;;  %4284 = vmatpush1.bf16.msra.mxu0 %v5817_v43  ;;  %v5886_v0 = vld [vmem:[#allocation6 + $0x440] ss:$16 sps:$4 sm:$0xff]   ;;  %v5889_v43 = vld [vmem:[#allocation6 + $0x448] ss:$16 sps:$4 sm:$0xff]  }
 0xe52   : > { %4121 = vmatprep.subr.bf16.mxu1 %v5822_v18  ;;  %4285 = vmatprep.subr.bf16.mxu0 %v5825_v19  ;;  %v5894_v18 = vld [vmem:[#allocation6 + $0x464] ss:$16 sps:$4 sm:$0xff]   ;;  %v5897_v19 = vld [vmem:[#allocation6 + $0x46c] ss:$16 sps:$4 sm:$0xff]  }
 0xe55   : > { %4122 = vmatpush1.bf16.msra.mxu1 %v5820_v20  ;;  %4286 = vmatpush1.bf16.msra.mxu0 %v5823_v21  ;;  %v5892_v20 = vld [vmem:[#allocation6 + $0x460] ss:$16 sps:$4 sm:$0xff]   ;;  %v5895_v21 = vld [vmem:[#allocation6 + $0x468] ss:$16 sps:$4 sm:$0xff]  }
 0xe56   : > { %4123 = vmatprep.subr.bf16.mxu1 %v5828_v22  ;;  %4287 = vmatprep.subr.bf16.mxu0 %v5831_v23  ;;  %v5900_v22 = vld [vmem:[#allocation6 + $0x484] ss:$16 sps:$4 sm:$0xff]   ;;  %v5903_v23 = vld [vmem:[#allocation6 + $0x48c] ss:$16 sps:$4 sm:$0xff]  }
 0xe59   : > { %4124 = vmatpush1.bf16.msra.mxu1 %v5826_v24  ;;  %4288 = vmatpush1.bf16.msra.mxu0 %v5829_v26  ;;  %v5898_v24 = vld [vmem:[#allocation6 + $0x480] ss:$16 sps:$4 sm:$0xff]   ;;  %v5901_v26 = vld [vmem:[#allocation6 + $0x488] ss:$16 sps:$4 sm:$0xff]  }
 0xe5a   : > { %4125 = vmatprep.subr.bf16.mxu1 %v5834_v32  ;;  %4289 = vmatprep.subr.bf16.mxu0 %v5837_v38  ;;  %v5906_v32 = vld [vmem:[#allocation6 + $0x4a4] ss:$16 sps:$4 sm:$0xff]   ;;  %v5909_v38 = vld [vmem:[#allocation6 + $0x4ac] ss:$16 sps:$4 sm:$0xff]  }
 0xe5d   : > { %4126 = vmatpush1.bf16.msra.mxu1 %v5832_v33  ;;  %4290 = vmatpush1.bf16.msra.mxu0 %v5835_v34  ;;  %v5904_v33 = vld [vmem:[#allocation6 + $0x4a0] ss:$16 sps:$4 sm:$0xff]   ;;  %v5907_v34 = vld [vmem:[#allocation6 + $0x4a8] ss:$16 sps:$4 sm:$0xff]  }
 0xe5e   : > { %4127 = vmatprep.subr.bf16.mxu1 %v5840_v36  ;;  %4291 = vmatprep.subr.bf16.mxu0 %v5843_v37  ;;  %v5912_v36 = vld [vmem:[#allocation6 + $0x4c4] ss:$16 sps:$4 sm:$0xff]   ;;  %v5915_v37 = vld [vmem:[#allocation6 + $0x4cc] ss:$16 sps:$4 sm:$0xff]  }
 0xe61   : > { %4128 = vmatpush1.bf16.msra.mxu1 %v5838_v39  ;;  %4292 = vmatpush1.bf16.msra.mxu0 %v5841_v41  ;;  %v5910_v39 = vld [vmem:[#allocation6 + $0x4c0] ss:$16 sps:$4 sm:$0xff]   ;;  %v5913_v41 = vld [vmem:[#allocation6 + $0x4c8] ss:$16 sps:$4 sm:$0xff]  }
 0xe62   : > { %4129 = vmatprep.subr.bf16.mxu1 %v5846_v42  ;;  %4293 = vmatprep.subr.bf16.mxu0 %v5849_v44  ;;  %v5918_v42 = vld [vmem:[#allocation6 + $0x4e4] ss:$16 sps:$4 sm:$0xff]   ;;  %v5921_v44 = vld [vmem:[#allocation6 + $0x4ec] ss:$16 sps:$4 sm:$0xff]  }
 0xe65   : > { %4130 = vmatpush1.bf16.msra.mxu1 %v5844_v45  ;;  %4294 = vmatpush1.bf16.msra.mxu0 %v5847_v46  ;;  %v5916_v45 = vld [vmem:[#allocation6 + $0x4e0] ss:$16 sps:$4 sm:$0xff]   ;;  %v5919_v46 = vld [vmem:[#allocation6 + $0x4e8] ss:$16 sps:$4 sm:$0xff]  }
 0xe66   : > { %4131 = vmatprep.subr.bf16.mxu1 %v5852_v48  ;;  %4295 = vmatprep.subr.bf16.mxu0 %v5855_v49  ;;  %v5924_v48 = vld [vmem:[#allocation6 + $0x504] ss:$16 sps:$4 sm:$0xff]   ;;  %v5927_v49 = vld [vmem:[#allocation6 + $0x50c] ss:$16 sps:$4 sm:$0xff]  }
 0xe69   : > { %4132 = vmatpush1.bf16.msra.mxu1 %v5850_v50  ;;  %4296 = vmatpush1.bf16.msra.mxu0 %v5853_v51  ;;  %v5922_v50 = vld [vmem:[#allocation6 + $0x500] ss:$16 sps:$4 sm:$0xff]   ;;  %v5925_v51 = vld [vmem:[#allocation6 + $0x508] ss:$16 sps:$4 sm:$0xff]  }
 0xe6a   : > { %4133 = vmatprep.subr.bf16.mxu1 %v5858_v52  ;;  %4297 = vmatprep.subr.bf16.mxu0 %v5861_v53  ;;  %v5930_v52 = vld [vmem:[#allocation6 + $0x524] ss:$16 sps:$4 sm:$0xff]   ;;  %v5933_v53 = vld [vmem:[#allocation6 + $0x52c] ss:$16 sps:$4 sm:$0xff]  }
 0xe6d   : > { %4134 = vmatpush1.bf16.msra.mxu1 %v5856_v54  ;;  %4298 = vmatpush1.bf16.msra.mxu0 %v5859_v55  ;;  %v5928_v54 = vld [vmem:[#allocation6 + $0x520] ss:$16 sps:$4 sm:$0xff]   ;;  %v5931_v55 = vld [vmem:[#allocation6 + $0x528] ss:$16 sps:$4 sm:$0xff]  }
 0xe6e   : > { %4135 = vmatprep.subr.bf16.mxu1 %v5864_v58  ;;  %4299 = vmatprep.subr.bf16.mxu0 %v5867_v61  ;;  %v5936_v58 = vld [vmem:[#allocation6 + $0x544] ss:$16 sps:$4 sm:$0xff]   ;;  %v5939_v61 = vld [vmem:[#allocation6 + $0x54c] ss:$16 sps:$4 sm:$0xff]  }
 0xe71   : > { %4136 = vmatpush1.bf16.msra.mxu1 %v5862_v63  ;;  %4300 = vmatpush1.bf16.msra.mxu0 %v5865_v1  ;;  %v5937_v63 = vld [vmem:[#allocation6 + $0x548] ss:$16 sps:$4 sm:$0xff]   ;;  %v5942_v1 = vld [vmem:[#allocation6 + $0x564] ss:$16 sps:$4 sm:$0xff]  }
 0xe72   : > { %4137 = vmatprep.subr.bf16.mxu1 %v5870_v3  ;;  %4301 = vmatprep.subr.bf16.mxu0 %v5873_v4  ;;  %v5940_v3 = vld [vmem:[#allocation6 + $0x560] ss:$16 sps:$4 sm:$0xff]   ;;  %v5943_v4 = vld [vmem:[#allocation6 + $0x568] ss:$16 sps:$4 sm:$0xff]  }
 0xe75   : > { %4138 = vmatpush1.bf16.msra.mxu1 %v5868_v6  ;;  %4302 = vmatpush1.bf16.msra.mxu0 %v5871_v40  ;;  %v5951_v6 = vld [vmem:[#allocation6 + $0x58c] ss:$16 sps:$4 sm:$0xff]   ;;  %v5946_v40 = vld [vmem:[#allocation6 + $0x580] ss:$16 sps:$4 sm:$0xff]  }
 0xe76   : > { %4148 = vmatprep.subr.bf16.mxu1 %v5876_v8  ;;  %4312 = vmatprep.subr.bf16.mxu0 %v5879_v9  ;;  %v5954_v8 = vld [vmem:[#allocation6 + $0x5a4] ss:$16 sps:$4 sm:$0xff]   ;;  %v5957_v9 = vld [vmem:[#allocation6 + $0x5ac] ss:$16 sps:$4 sm:$0xff]  }
 0xe78   : > { %4140 = vmatmul.mubr.bf16.vlgmr.msra.gmra.mrb[32].mxu1 %v2502_v12  ;;  %4304 = vmatmul.mubr.bf16.vlgmr.msra.gmra.mrb[40].mxu0 %v2502_v12  ;;  %v5955_v12 = vld [vmem:[#allocation6 + $0x5a8] ss:$16 sps:$4 sm:$0xff]  }
 0xe79   : > { %4149 = vmatpush1.bf16.msra.mxu1 %v5874_v11  ;;  %4180 = vmatprep.mubr.bf16.mxu1 %v2505_v14  ;;  %v1930_v11 = vsub.s32 4, %v6770_v27 }
 0xe7a   : > { %4313 = vmatpush1.bf16.msra.mxu0 %v5877_v13  ;;  %4344 = vmatprep.mubr.bf16.mxu0 %v2505_v14  ;;  %v5960_v13 = vld [vmem:[#allocation6 + $0x5c4] ss:$16 sps:$4 sm:$0xff]   ;;  %v5963_v14 = vld [vmem:[#allocation6 + $0x5cc] ss:$16 sps:$4 sm:$0xff]  }
 0xe7b   : > { %4150 = vmatprep.subr.bf16.mxu1 %v5882_v15  ;;  %4314 = vmatprep.subr.bf16.mxu0 %v5885_v16  ;;  %v1942_v15 = vsub.s32 7, %v6770_v27  ;;  %v5958_v16 = vld [vmem:[#allocation6 + $0x5c0] ss:$16 sps:$4 sm:$0xff]  }
 0xe7d   : > { %4151 = vmatpush1.bf16.msra.mxu1 %v5880_v35  ;;  %v1931_v35 = vrot.slane %v6776_v29, %v1930_v11  ;;  %v6032_v11 = vld [vmem:[#allocation6 + $0x744] ss:$16 sps:$4 sm:$0xff]  }
 0xe7e   : > { %4315 = vmatpush1.bf16.msra.mxu0 %v5883_v47  ;;  %4152 = vmatprep.subr.bf16.mxu1 %v5888_v17  ;;  %v5961_v47 = vld [vmem:[#allocation6 + $0x5c8] ss:$16 sps:$4 sm:$0xff]   ;;  %v5966_v17 = vld [vmem:[#allocation6 + $0x5e4] ss:$16 sps:$4 sm:$0xff]  }
 0xe7f   : > { %4316 = vmatprep.subr.bf16.mxu0 %v5891_v59  ;;  %v5969_v59 = vld [vmem:[#allocation6 + $0x5ec] ss:$16 sps:$4 sm:$0xff]  }
 0xe81   : > { %4153 = vmatpush1.bf16.msra.mxu1 %v5886_v0  ;;  %v1943_v0 = vrot.slane %v6776_v29, %v1942_v15  ;;  %v6038_v15 = vld [vmem:[#allocation6 + $0x764] ss:$16 sps:$4 sm:$0xff]  }
 0xe82   : > { %4317 = vmatpush1.bf16.msra.mxu0 %v5889_v43  ;;  %4154 = vmatprep.subr.bf16.mxu1 %v5894_v18  ;;  %v5964_v43 = vld [vmem:[#allocation6 + $0x5e0] ss:$16 sps:$4 sm:$0xff]   ;;  %v5525_v18 = vadd.f32 %v6791_v56, %v1931_v35 }
 0xe83   : > { %4318 = vmatprep.subr.bf16.mxu0 %v5897_v19  ;;  %v5967_v19 = vld [vmem:[#allocation6 + $0x5e8] ss:$16 sps:$4 sm:$0xff]   ;;  %v5976_v56 = vld [vmem:[#allocation6 + $0x620] ss:$16 sps:$4 sm:$0xff]  }
 0xe84   : > { %v6036_v35 = vld [vmem:[#allocation6 + $0x760] ss:$16 sps:$4 sm:$0xff]  }
 0xe85   : > { %4155 = vmatpush1.bf16.msra.mxu1 %v5892_v20  ;;  %v5972_v20 = vld [vmem:[#allocation6 + $0x604] ss:$16 sps:$4 sm:$0xff]  }
 0xe86   : > { %4319 = vmatpush1.bf16.msra.mxu0 %v5895_v21  ;;  %4156 = vmatprep.subr.bf16.mxu1 %v5900_v22  ;;  %v5975_v21 = vld [vmem:[#allocation6 + $0x60c] ss:$16 sps:$4 sm:$0xff]   ;;  %v5528_v22 = vadd.f32 %v6797_v60, %v1943_v0  ;;  %v6042_v0 = vld [vmem:[#allocation6 + $0x780] ss:$16 sps:$4 sm:$0xff]  }
 0xe87   : > { %4320 = vmatprep.subr.bf16.mxu0 %v5903_v23  ;;  %v5970_v23 = vld [vmem:[#allocation6 + $0x600] ss:$16 sps:$4 sm:$0xff]   ;;  %v5987_v60 = vld [vmem:[#allocation6 + $0x64c] ss:$16 sps:$4 sm:$0xff]  }
 0xe89   : > { %4157 = vmatpush1.bf16.msra.mxu1 %v5898_v24  ;;  %v2504_v24 = vpack.c.bf16 %v5525_v18, %v5525_v18  ;;  %v6050_v18 = vld [vmem:[#allocation6 + $0x7a4] ss:$16 sps:$4 sm:$0xff]  }
 0xe8a   : > { %4321 = vmatpush1.bf16.msra.mxu0 %v5901_v26  ;;  %4158 = vmatprep.subr.bf16.mxu1 %v5906_v32  ;;  %v5973_v26 = vld [vmem:[#allocation6 + $0x608] ss:$16 sps:$4 sm:$0xff]   ;;  %v5978_v32 = vld [vmem:[#allocation6 + $0x624] ss:$16 sps:$4 sm:$0xff]  }
 0xe8b   : > { %4322 = vmatprep.subr.bf16.mxu0 %v5909_v38  ;;  %v2507_v38 = vpack.c.bf16 %v5528_v22, %v5528_v22  ;;  %v6051_v22 = vld [vmem:[#allocation6 + $0x7a8] ss:$16 sps:$4 sm:$0xff]  }
 0xe8d   : > { %4159 = vmatpush1.bf16.msra.mxu1 %v5904_v33  ;;  %v5981_v33 = vld [vmem:[#allocation6 + $0x62c] ss:$16 sps:$4 sm:$0xff]  }
 0xe8e   : > { %4323 = vmatpush1.bf16.msra.mxu0 %v5907_v34  ;;  %4160 = vmatprep.subr.bf16.mxu1 %v5912_v36  ;;  %v5979_v34 = vld [vmem:[#allocation6 + $0x628] ss:$16 sps:$4 sm:$0xff]   ;;  %v5984_v36 = vld [vmem:[#allocation6 + $0x644] ss:$16 sps:$4 sm:$0xff]  }
 0xe8f   : > { %4324 = vmatprep.subr.bf16.mxu0 %v5915_v37  ;;  %v5982_v37 = vld [vmem:[#allocation6 + $0x640] ss:$16 sps:$4 sm:$0xff]  }
 0xe91   : > { %4161 = vmatpush1.bf16.msra.mxu1 %v5910_v39  ;;  %v5985_v39 = vld [vmem:[#allocation6 + $0x648] ss:$16 sps:$4 sm:$0xff]  }
 0xe92   : > { %4325 = vmatpush1.bf16.msra.mxu0 %v5913_v41  ;;  %4162 = vmatprep.subr.bf16.mxu1 %v5918_v42  ;;  %v5990_v41 = vld [vmem:[#allocation6 + $0x664] ss:$16 sps:$4 sm:$0xff]   ;;  %v5993_v42 = vld [vmem:[#allocation6 + $0x66c] ss:$16 sps:$4 sm:$0xff]  }
 0xe93   : > { %4326 = vmatprep.subr.bf16.mxu0 %v5921_v44  ;;  %v5988_v44 = vld [vmem:[#allocation6 + $0x660] ss:$16 sps:$4 sm:$0xff]  }
 0xe95   : > { %4163 = vmatpush1.bf16.msra.mxu1 %v5916_v45  ;;  %v5991_v45 = vld [vmem:[#allocation6 + $0x668] ss:$16 sps:$4 sm:$0xff]  }
 0xe96   : > { %4327 = vmatpush1.bf16.msra.mxu0 %v5919_v46  ;;  %4164 = vmatprep.subr.bf16.mxu1 %v5924_v48  ;;  %v5996_v46 = vld [vmem:[#allocation6 + $0x684] ss:$16 sps:$4 sm:$0xff]   ;;  %v5999_v48 = vld [vmem:[#allocation6 + $0x68c] ss:$16 sps:$4 sm:$0xff]  }
 0xe97   : > { %4328 = vmatprep.subr.bf16.mxu0 %v5927_v49  ;;  %v5994_v49 = vld [vmem:[#allocation6 + $0x680] ss:$16 sps:$4 sm:$0xff]  }
 0xe99   : > { %4165 = vmatpush1.bf16.msra.mxu1 %v5922_v50  ;;  %v5997_v50 = vld [vmem:[#allocation6 + $0x688] ss:$16 sps:$4 sm:$0xff]  }
 0xe9a   : > { %4329 = vmatpush1.bf16.msra.mxu0 %v5925_v51  ;;  %4166 = vmatprep.subr.bf16.mxu1 %v5930_v52  ;;  %v6002_v51 = vld [vmem:[#allocation6 + $0x6a4] ss:$16 sps:$4 sm:$0xff]   ;;  %v6005_v52 = vld [vmem:[#allocation6 + $0x6ac] ss:$16 sps:$4 sm:$0xff]  }
 0xe9b   : > { %4330 = vmatprep.subr.bf16.mxu0 %v5933_v53  ;;  %v6000_v53 = vld [vmem:[#allocation6 + $0x6a0] ss:$16 sps:$4 sm:$0xff]  }
 0xe9d   : > { %4167 = vmatpush1.bf16.msra.mxu1 %v5928_v54  ;;  %v6003_v54 = vld [vmem:[#allocation6 + $0x6a8] ss:$16 sps:$4 sm:$0xff]  }
 0xe9e   : > { %4331 = vmatpush1.bf16.msra.mxu0 %v5931_v55  ;;  %4168 = vmatprep.subr.bf16.mxu1 %v5936_v58  ;;  %v6008_v55 = vld [vmem:[#allocation6 + $0x6c4] ss:$16 sps:$4 sm:$0xff]   ;;  %v6011_v58 = vld [vmem:[#allocation6 + $0x6cc] ss:$16 sps:$4 sm:$0xff]  }
 0xe9f   : > { %4332 = vmatprep.subr.bf16.mxu0 %v5939_v61  ;;  %v6006_v61 = vld [vmem:[#allocation6 + $0x6c0] ss:$16 sps:$4 sm:$0xff]  }
 0xea1   : > { %4169 = vmatpush1.bf16.msra.mxu1 %v5934_v62  ;;  %v6009_v62 = vld [vmem:[#allocation6 + $0x6c8] ss:$16 sps:$4 sm:$0xff]  }
 0xea2   : > { %4333 = vmatpush1.bf16.msra.mxu0 %v5937_v63  ;;  %4170 = vmatprep.subr.bf16.mxu1 %v5942_v1  ;;  %v6014_v63 = vld [vmem:[#allocation6 + $0x6e4] ss:$16 sps:$4 sm:$0xff]   ;;  %v6017_v1 = vld [vmem:[#allocation6 + $0x6ec] ss:$16 sps:$4 sm:$0xff]  }
 0xea3   : > { %4334 = vmatprep.subr.bf16.mxu0 %v5945_v2  ;;  %v6012_v2 = vld [vmem:[#allocation6 + $0x6e0] ss:$16 sps:$4 sm:$0xff]  }
 0xea5   : > { %4171 = vmatpush1.bf16.msra.mxu1 %v5940_v3  ;;  %v6015_v3 = vld [vmem:[#allocation6 + $0x6e8] ss:$16 sps:$4 sm:$0xff]  }
 0xea6   : > { %4335 = vmatpush1.bf16.msra.mxu0 %v5943_v4  ;;  %4172 = vmatprep.subr.bf16.mxu1 %v5948_v5  ;;  %v6020_v4 = vld [vmem:[#allocation6 + $0x704] ss:$16 sps:$4 sm:$0xff]   ;;  %v6023_v5 = vld [vmem:[#allocation6 + $0x70c] ss:$16 sps:$4 sm:$0xff]  }
 0xea7   : > { %4336 = vmatprep.subr.bf16.mxu0 %v5951_v6  ;;  %v6018_v6 = vld [vmem:[#allocation6 + $0x700] ss:$16 sps:$4 sm:$0xff]  }
 0xea9   : > { %4173 = vmatpush1.bf16.msra.mxu1 %v5946_v40  ;;  %v6021_v40 = vld [vmem:[#allocation6 + $0x708] ss:$16 sps:$4 sm:$0xff]  }
 0xeaa   : > { %4337 = vmatpush1.bf16.msra.mxu0 %v5949_v7  ;;  %4174 = vmatprep.subr.bf16.mxu1 %v5954_v8  ;;  %v6026_v7 = vld [vmem:[#allocation6 + $0x724] ss:$16 sps:$4 sm:$0xff]   ;;  %v6029_v8 = vld [vmem:[#allocation6 + $0x72c] ss:$16 sps:$4 sm:$0xff]  }
 0xeab   : > { %4338 = vmatprep.subr.bf16.mxu0 %v5957_v9  ;;  %v6024_v9 = vld [vmem:[#allocation6 + $0x720] ss:$16 sps:$4 sm:$0xff]  }
 0xead   : > { %4175 = vmatpush1.bf16.msra.mxu1 %v5952_v10  ;;  %v6027_v10 = vld [vmem:[#allocation6 + $0x728] ss:$16 sps:$4 sm:$0xff]  }
 0xeae   : > { %4339 = vmatpush1.bf16.msra.mxu0 %v5955_v12  ;;  %4176 = vmatprep.subr.bf16.mxu1 %v5960_v13  ;;  %v6035_v12 = vld [vmem:[#allocation6 + $0x74c] ss:$16 sps:$4 sm:$0xff]   ;;  %v6030_v13 = vld [vmem:[#allocation6 + $0x740] ss:$16 sps:$4 sm:$0xff]  }
 0xeaf   : > { %4340 = vmatprep.subr.bf16.mxu0 %v5963_v14  ;;  %v6033_v14 = vld [vmem:[#allocation6 + $0x748] ss:$16 sps:$4 sm:$0xff]  }
 0xeb1   : > { %4177 = vmatpush1.bf16.msra.mxu1 %v5958_v16  ;;  %v6041_v16 = vld [vmem:[#allocation6 + $0x76c] ss:$16 sps:$4 sm:$0xff]  }
 0xeb2   : > { %4341 = vmatpush1.bf16.msra.mxu0 %v5961_v47  ;;  %4178 = vmatprep.subr.bf16.mxu1 %v5966_v17  ;;  %v6039_v47 = vld [vmem:[#allocation6 + $0x768] ss:$16 sps:$4 sm:$0xff]   ;;  %v6044_v17 = vld [vmem:[#allocation6 + $0x784] ss:$16 sps:$4 sm:$0xff]  }
 0xeb3   : > { %4342 = vmatprep.subr.bf16.mxu0 %v5969_v59  ;;  %v6047_v59 = vld [vmem:[#allocation6 + $0x78c] ss:$16 sps:$4 sm:$0xff]  }
 0xeb5   : > { %4179 = vmatpush1.bf16.msra.mxu1 %v5964_v43  ;;  %v6045_v43 = vld [vmem:[#allocation6 + $0x788] ss:$16 sps:$4 sm:$0xff]  }
 0xeb6   : > { %4343 = vmatpush1.bf16.msra.mxu0 %v5967_v19  ;;  %4189 = vmatprep.subr.bf16.mxu1 %v5972_v20  ;;  %v6053_v19 = vld [vmem:[#allocation6 + $0x7ac] ss:$16 sps:$4 sm:$0xff]   ;;  %v6048_v20 = vld [vmem:[#allocation6 + $0x7a0] ss:$16 sps:$4 sm:$0xff]  }
 0xeb7   : > { %4353 = vmatprep.subr.bf16.mxu0 %v5975_v21  ;;  %v1938_v21 = vsub.s32 6, %v6770_v27 }
 0xeb8   : > { %4181 = vmatmul.mubr.bf16.vlgmr.msra.gmra.mrb[32].mxu1 %v2504_v24 }
 0xeb9   : > { %4345 = vmatmul.mubr.bf16.vlgmr.msra.gmra.mrb[40].mxu0 %v2504_v24  ;;  %4190 = vmatpush1.bf16.msra.mxu1 %v5970_v23  ;;  %v6056_v23 = vld [vmem:[#allocation6 + $0x7c4] ss:$16 sps:$4 sm:$0xff]   ;;  %v6059_v24 = vld [vmem:[#allocation6 + $0x7cc] ss:$16 sps:$4 sm:$0xff]  }
 0xeba   : > { %4221 = vmatprep.mubr.bf16.mxu1 %v2507_v38  ;;  %4354 = vmatpush1.bf16.msra.mxu0 %v5973_v26  ;;  %v6054_v26 = vld [vmem:[#allocation6 + $0x7c0] ss:$16 sps:$4 sm:$0xff]  }
 0xebb   : > { %4385 = vmatprep.mubr.bf16.mxu0 %v2507_v38  ;;  %4191 = vmatprep.subr.bf16.mxu1 %v5978_v32  ;;  %v1939_v32 = vrot.slane %v6776_v29, %v1938_v21  ;;  %v6057_v38 = vld [vmem:[#allocation6 + $0x7c8] ss:$16 sps:$4 sm:$0xff]  }
 0xebc   : > { %4355 = vmatprep.subr.bf16.mxu0 %v5981_v33  ;;  %v6062_v33 = vld [vmem:[#allocation6 + $0x7e4] ss:$16 sps:$4 sm:$0xff]   ;;  %v6067_v29 = vld [vmem:[%s7040_s18 + $0xc0] sm:$0xff]  }
 0xebd   : > { %4192 = vmatpush1.bf16.msra.mxu1 %v5976_v56  ;;  %v6065_v56 = vld [vmem:[#allocation6 + $0x7ec] ss:$16 sps:$4 sm:$0xff]  }
 0xebe   : > { %4356 = vmatpush1.bf16.msra.mxu0 %v5979_v34  ;;  %4193 = vmatprep.subr.bf16.mxu1 %v5984_v36  ;;  %v6060_v34 = vld [vmem:[#allocation6 + $0x7e0] ss:$16 sps:$4 sm:$0xff]   ;;  %v5527_v36 = vadd.f32 %v6793_v25, %v1939_v32  ;;  %v6069_v25 = vld [vmem:[%s7040_s18 + $0x80] sm:$0xff]  }
 0xebf   : > { %4357 = vmatprep.subr.bf16.mxu0 %v5987_v60  ;;  %v6063_v60 = vld [vmem:[#allocation6 + $0x7e8] ss:$16 sps:$4 sm:$0xff]  }
 0xec1   : > { %4194 = vmatpush1.bf16.msra.mxu1 %v5982_v37  ;;  %v6066_v37 = vld [vmem:[%s7040_s18 + $0x40] sm:$0xff]  }
 0xec2   : > { %4358 = vmatpush1.bf16.msra.mxu0 %v5985_v39  ;;  %4195 = vmatprep.subr.bf16.mxu1 %v5990_v41  ;;  %v6068_v39 = vld [vmem:[%s7040_s18] sm:$0xff]   ;;  %v2506_v41 = vpack.c.bf16 %v5527_v36, %v5527_v36 }
 0xec3   : > { %4359 = vmatprep.subr.bf16.mxu0 %v5993_v42  ;;  %v6070_v42 = vld [vmem:[%s7040_s18 + $0x48] sm:$0xff]  }
 0xec5   : > { %4196 = vmatpush1.bf16.msra.mxu1 %v5988_v44  ;;  %v6071_v44 = vld [vmem:[%s7040_s18 + $0xc8] sm:$0xff]  }
 0xec6   : > { %4360 = vmatpush1.bf16.msra.mxu0 %v5991_v45  ;;  %4197 = vmatprep.subr.bf16.mxu1 %v5996_v46  ;;  %v6072_v45 = vld [vmem:[%s7040_s18 + $0x8] sm:$0xff]  }
 0xec7   : > { %4361 = vmatprep.subr.bf16.mxu0 %v5999_v48  ;;  %v6073_v46 = vld [vmem:[%s7040_s18 + $0x88] sm:$0xff]   ;;  %v6074_v48 = vld [vmem:[%s7040_s18 + $0x50] sm:$0xff]  }
 0xec9   : > { %4198 = vmatpush1.bf16.msra.mxu1 %v5994_v49  ;;  %v6075_v49 = vld [vmem:[%s7040_s18 + $0xd0] sm:$0xff]  }
 0xeca   : > { %4362 = vmatpush1.bf16.msra.mxu0 %v5997_v50  ;;  %4199 = vmatprep.subr.bf16.mxu1 %v6002_v51  ;;  %v6076_v50 = vld [vmem:[%s7040_s18 + $0x10] sm:$0xff]  }
 0xecb   : > { %4363 = vmatprep.subr.bf16.mxu0 %v6005_v52  ;;  %v6077_v51 = vld [vmem:[%s7040_s18 + $0x90] sm:$0xff]   ;;  %v6078_v52 = vld [vmem:[%s7040_s18 + $0x58] sm:$0xff]  }
 0xecd   : > { %4200 = vmatpush1.bf16.msra.mxu1 %v6000_v53  ;;  %v6079_v53 = vld [vmem:[%s7040_s18 + $0xd8] sm:$0xff]  }
 0xece   : > { %4364 = vmatpush1.bf16.msra.mxu0 %v6003_v54  ;;  %4201 = vmatprep.subr.bf16.mxu1 %v6008_v55  ;;  %v6080_v54 = vld [vmem:[%s7040_s18 + $0x18] sm:$0xff]  }
 0xecf   : > { %4365 = vmatprep.subr.bf16.mxu0 %v6011_v58  ;;  %v6081_v55 = vld [vmem:[%s7040_s18 + $0x98] sm:$0xff]   ;;  %v6082_v58 = vld [vmem:[%s7040_s18 + $0x60] sm:$0xff]  }
 0xed1   : > { %4202 = vmatpush1.bf16.msra.mxu1 %v6006_v61  ;;  %v6083_v61 = vld [vmem:[%s7040_s18 + $0xe0] sm:$0xff]  }
 0xed2   : > { %4366 = vmatpush1.bf16.msra.mxu0 %v6009_v62  ;;  %4203 = vmatprep.subr.bf16.mxu1 %v6014_v63  ;;  %v6084_v62 = vld [vmem:[%s7040_s18 + $0x20] sm:$0xff]  }
 0xed3   : > { %4367 = vmatprep.subr.bf16.mxu0 %v6017_v1  ;;  %v6085_v63 = vld [vmem:[%s7040_s18 + $0xa0] sm:$0xff]   ;;  %v6086_v1 = vld [vmem:[%s7040_s18 + $0x68] sm:$0xff]  }
 0xed5   : > { %4204 = vmatpush1.bf16.msra.mxu1 %v6012_v2  ;;  %v6087_v2 = vld [vmem:[%s7040_s18 + $0xe8] sm:$0xff]  }
 0xed6   : > { %4368 = vmatpush1.bf16.msra.mxu0 %v6015_v3  ;;  %4205 = vmatprep.subr.bf16.mxu1 %v6020_v4  ;;  %v6088_v3 = vld [vmem:[%s7040_s18 + $0x28] sm:$0xff]  }
 0xed7   : > { %4369 = vmatprep.subr.bf16.mxu0 %v6023_v5  ;;  %v6089_v4 = vld [vmem:[%s7040_s18 + $0xa8] sm:$0xff]   ;;  %v6090_v5 = vld [vmem:[%s7040_s18 + $0x70] sm:$0xff]  }
 0xed9   : > { %4206 = vmatpush1.bf16.msra.mxu1 %v6018_v6  ;;  %v6091_v6 = vld [vmem:[%s7040_s18 + $0xf0] sm:$0xff]  }
 0xeda   : > { %4370 = vmatpush1.bf16.msra.mxu0 %v6021_v40  ;;  %4207 = vmatprep.subr.bf16.mxu1 %v6026_v7  ;;  %v6092_v40 = vld [vmem:[%s7040_s18 + $0x30] sm:$0xff]  }
 0xedb   : > { %4371 = vmatprep.subr.bf16.mxu0 %v6029_v8  ;;  %v6093_v7 = vld [vmem:[%s7040_s18 + $0xb0] sm:$0xff]   ;;  %v6094_v8 = vld [vmem:[%s7040_s18 + $0x78] sm:$0xff]  }
 0xedd   : > { %4208 = vmatpush1.bf16.msra.mxu1 %v6024_v9  ;;  %v6095_v9 = vld [vmem:[%s7040_s18 + $0xf8] sm:$0xff]  }
 0xede   : > { %4372 = vmatpush1.bf16.msra.mxu0 %v6027_v10  ;;  %4209 = vmatprep.subr.bf16.mxu1 %v6032_v11  ;;  %v6096_v10 = vld [vmem:[%s7040_s18 + $0x38] sm:$0xff]  }
 0xedf   : > { %4373 = vmatprep.subr.bf16.mxu0 %v6035_v12  ;;  %v6097_v11 = vld [vmem:[%s7040_s18 + $0xb8] sm:$0xff]   ;;  %v2764_v12 = vld [vmem:[%s7039_s17] sm:$0xf] }
 0xee1   : > { %4210 = vmatpush1.bf16.msra.mxu1 %v6030_v13  ;;  %v2769_v13 = vrot.slane %v2764_v12, %v1914_v28 }
 0xee2   : > { %4374 = vmatpush1.bf16.msra.mxu0 %v6033_v14  ;;  %4211 = vmatprep.subr.bf16.mxu1 %v6038_v15  ;;  %v2777_v14 = vrot.slane %v2764_v12, %v1922_v57  ;;  %v2773_v15 = vrot.slane %v2764_v12, %v1918_v30 }
 0xee3   : > { %4375 = vmatprep.subr.bf16.mxu0 %v6041_v16  ;;  %v2781_v16 = vrot.slane %v2764_v12, %v1926_v31 }
 0xee5   : > { %4212 = vmatpush1.bf16.msra.mxu1 %v6036_v35 }
 0xee6   : > { %4376 = vmatpush1.bf16.msra.mxu0 %v6039_v47  ;;  %4213 = vmatprep.subr.bf16.mxu1 %v6044_v17 }
 0xee7   : > { %4377 = vmatprep.subr.bf16.mxu0 %v6047_v59 }
 0xee9   : > { %4214 = vmatpush1.bf16.msra.mxu1 %v6042_v0 }
 0xeea   : > { %4378 = vmatpush1.bf16.msra.mxu0 %v6045_v43  ;;  %4215 = vmatprep.subr.bf16.mxu1 %v6050_v18 }
 0xeeb   : > { %4379 = vmatprep.subr.bf16.mxu0 %v6053_v19 }
 0xeed   : > { %4216 = vmatpush1.bf16.msra.mxu1 %v6048_v20 }
 0xeee   : > { %4380 = vmatpush1.bf16.msra.mxu0 %v6051_v22  ;;  %4217 = vmatprep.subr.bf16.mxu1 %v6056_v23 }
 0xeef   : > { %4381 = vmatprep.subr.bf16.mxu0 %v6059_v24 }
 0xef1   : > { %4218 = vmatpush1.bf16.msra.mxu1 %v6054_v26 }
 0xef2   : > { %4382 = vmatpush1.bf16.msra.mxu0 %v6057_v38  ;;  %4219 = vmatprep.subr.bf16.mxu1 %v6062_v33 }
 0xef3   : > { %4383 = vmatprep.subr.bf16.mxu0 %v6065_v56 }
 0xef5   : > { %4220 = vmatpush1.bf16.msra.mxu1 %v6060_v34 }
 0xef6   : > { %4384 = vmatpush1.bf16.msra.mxu0 %v6063_v60  ;;  %5379 = vmatprep.subr.bf16.mxu1 %v6066_v37 }
 0xef7   : > { %5401 = vmatprep.subr.bf16.mxu0 %v6067_v29 }
 0xef8   : > { %4222 = vmatmul.mubr.bf16.vlgmr.msra.gmra.mrb[32].mxu1 %v2506_v41 }
 0xef9   : > { %4386 = vmatmul.mubr.bf16.vlgmr.msra.gmra.mrb[40].mxu0 %v2506_v41  ;;  %5380 = vmatpush3.bf16.msra.mxu1 %v6068_v39 }
 0xefa   : > { %5402 = vmatpush3.bf16.msra.mxu0 %v6069_v25  ;;  %5381 = vmatprep.subr.bf16.mxu1 %v6070_v42 }
 0xefb   : > { %5403 = vmatprep.subr.bf16.mxu0 %v6071_v44 }
 0xefd   : > { %5382 = vmatpush3.bf16.msra.mxu1 %v6072_v45 }
 0xefe   : > { %5404 = vmatpush3.bf16.msra.mxu0 %v6073_v46  ;;  %5383 = vmatprep.subr.bf16.mxu1 %v6074_v48 }
 0xeff   : > { %5405 = vmatprep.subr.bf16.mxu0 %v6075_v49 }
 0xf01   : > { %5384 = vmatpush3.bf16.msra.mxu1 %v6076_v50 }
 0xf02   : > { %5406 = vmatpush3.bf16.msra.mxu0 %v6077_v51  ;;  %5385 = vmatprep.subr.bf16.mxu1 %v6078_v52 }
 0xf03   : > { %5407 = vmatprep.subr.bf16.mxu0 %v6079_v53 }
 0xf05   : > { %5386 = vmatpush3.bf16.msra.mxu1 %v6080_v54 }
 0xf06   : > { %5408 = vmatpush3.bf16.msra.mxu0 %v6081_v55  ;;  %5387 = vmatprep.subr.bf16.mxu1 %v6082_v58 }
 0xf07   : > { %5409 = vmatprep.subr.bf16.mxu0 %v6083_v61 }
 0xf09   : > { %5388 = vmatpush3.bf16.msra.mxu1 %v6084_v62 }
 0xf0a   : > { %5410 = vmatpush3.bf16.msra.mxu0 %v6085_v63  ;;  %5389 = vmatprep.subr.bf16.mxu1 %v6086_v1 }
 0xf0b   : > { %5411 = vmatprep.subr.bf16.mxu0 %v6087_v2 }
 0xf0d   : > { %5390 = vmatpush3.bf16.msra.mxu1 %v6088_v3 }
 0xf0e   : > { %5412 = vmatpush3.bf16.msra.mxu0 %v6089_v4  ;;  %5391 = vmatprep.subr.bf16.mxu1 %v6090_v5 }
 0xf0f   : > { %5413 = vmatprep.subr.bf16.mxu0 %v6091_v6 }
 0xf11   : > { %5392 = vmatpush3.bf16.msra.mxu1 %v6092_v40 }
 0xf12   : > { %5414 = vmatpush3.bf16.msra.mxu0 %v6093_v7  ;;  %5393 = vmatprep.subr.bf16.mxu1 %v6094_v8 }
 0xf13   : > { %5415 = vmatprep.subr.bf16.mxu0 %v6095_v9 }
 0xf15   : > { %5394 = vmatpush3.bf16.msra.mxu1 %v6096_v10 }
 0xf16   : > { %5416 = vmatpush3.bf16.msra.mxu0 %v6097_v11 }
 0xfcb   : > { %v4223_v35 = vpop.f32.mrb[32].mxu1 }
 0xfcc   : > { %v5529_v47 = vadd.f32 %v4223_v35, %v2769_v13  ;;  %v4387_v17 = vpop.f32.mrb[40].mxu0  ;;  %v4225_v59 = vpop.f32.mrb[33].mxu1 }
 0xfcd   : > { %v5531_v0 = vadd.f32 %v4387_v17, %v2777_v14  ;;  %v5530_v43 = vadd.f32 %v4225_v59, %v2773_v15  ;;  %v4389_v18 = vpop.f32.mrb[41].mxu0  ;;  %v4227_v19 = vpop.f32.mrb[34].mxu1 }
 0xfce   : > { %v5532_v28 = vadd.f32 %v4389_v18, %v2781_v16  ;;  %v4391_v20 = vpop.f32.mrb[42].mxu0  ;;  %v4228_v57 = vpop.f32.mrb[35].mxu1  ;;  %v4394_v27 = vpack.c.bf16 %v5529_v47, %v5529_v47 }
 0xfcf   : > { %v4395_v30 = vpack.c.bf16 %v5530_v43, %v5530_v43  ;;  %v4392_v21 = vpop.f32.mrb[43].mxu0  ;;  %v4396_v22 = vpack.c.bf16 %v5531_v0, %v5531_v0 }
 0xfd0   : > { %v4397_v31 = vpack.c.bf16 %v5532_v28, %v5532_v28 }
 0xfd1   : > { %4693 = vmatprep.mubr.bf16.mxu1 %v4395_v30 }
 0xfd2   : > { %4733 = vmatprep.mubr.bf16.mxu0 %v4397_v31  ;;  %4694 = vmatmul.mubr.bf16.vlgmr.msra.gmra.mrb[36].mxu1 %v4394_v27 }
 0xfd3   : > { %4734 = vmatmul.mubr.bf16.vlgmr.msra.gmra.mrb[44].mxu0 %v4396_v22 }
 0xfd4   : > { %6183 = shalt.err (!%p6180_p11)
}
 0xfd5   : > { %s6184_s27 = scalar_lea.hbm %s6935_s24, 256  ;;  %s6188_s5 = scalar_lea.hbm %s7043_s21, 512 }
 0xfd6   : > { %p6185_p13 = scmp.ne.s32.totalorder %s6935_s24, %s6184_s27  ;;  %p6189_p6 = scmp.lt.u32.totalorder %s6935_s24, %s7043_s21 }
 0xfd7   : > { %p6190_p9 = scmp.lt.u32.totalorder %s6188_s5, %s6184_s27  ;;  %p6192_p12 = scmp.lt.u32.totalorder %s6184_s27, %s6935_s24 }
 0xfd8   : > { %p6186_p0 = pnand %p6185_p13, %p7106_p1 }
 0xfd9   : > { %p6191_p10 = por %p6190_p9, %p6189_p6 }
 0xfda   : > { %p6187_p5 = pneg %p6186_p0 }
 0xfdb   : > { %p6193_p2 = por %p6192_p12, %p6191_p10 }
 0xfdd   : > { %p6194_p3 = pnand %p6193_p2, %p6187_p5 }
 0xfdf   : > { %6197 = shalt.err (!%p6194_p3)
}
 0xfe0   : > { %s6290_s22 = smov 128   ;;  %s6291_s2 = smov 8  }
 0xfe1   : > { %5597 = dma.vmem_to_hbm [thread:$0]  (%p7106_p1), %s6925_s3, 256, %s6935_s24, %s4748_s20, %s6290_s22, %s6290_s22, %s6291_s2  }
 0xfe2   : > { %s7107_s25 = sshll.u32 %s6429_s4, 8  ;;  %s7108_s1 = sld [smem:[#allocation34_spill]] }
 0xfe3   : > { %s4753_s30 = scalar_lea.sflag [#allocation10], %s6615_s29  ;;  %s6198_s7 = scalar_lea.vmem %s6927_s23, 256 }
 0xfe4   : > { %p6199_p4 = scmp.ne.s32.totalorder %s6927_s23, %s6198_s7  ;;  %s6292_s8 = smov [#allocation9]  }
 0xfe5   : > { %s6202_s9 = sshll.u32 %s6292_s8, 4  ;;  %s6203_s9 = int_to_ptr.vmem [resolvable:$false] %s6202_s9 }
 0xfe6   : > { %p6200_p7 = pnand %p6199_p4, %p7106_p1  ;;  %s6204_s10 = scalar_lea.vmem %s6203_s9, 512 }
 0xfe7   : > { %p6205_p11 = scmp.lt.s32.totalorder %s6927_s23, %s6203_s9  ;;  %p6206_p13 = scmp.lt.s32.totalorder %s6204_s10, %s6198_s7 }
 0xfe8   : > { %s6969_s5 = scalar_lea.hbm %s7108_s1, %s7107_s25  ;;  %p6201_p8 = pneg %p6200_p7 }
 0xfe9   : > { %p6207_p0 = por %p6206_p13, %p6205_p11 }
 0xfeb   : > { %p6208_p5 = pnand %p6207_p0, %p6201_p8 }
 0xfed   : > { %6211 = shalt.err (!%p6208_p5)
}
 0xfee   : > { %s6212_s4 = scalar_lea.hbm %s6969_s5, 256  ;;  %s6216_s8 = scalar_lea.hbm %s7108_s1, 512 }
 0xfef   : > { %p6213_p6 = scmp.ne.s32.totalorder %s6969_s5, %s6212_s4  ;;  %p6217_p12 = scmp.lt.u32.totalorder %s6969_s5, %s7108_s1 }
 0xff0   : > { %p6218_p2 = scmp.lt.u32.totalorder %s6216_s8, %s6212_s4  ;;  %p6220_p4 = scmp.lt.u32.totalorder %s6212_s4, %s6969_s5 }
 0xff1   : > { %p6214_p9 = pnand %p6213_p6, %p7106_p1 }
 0xff2   : > { %p6219_p3 = por %p6218_p2, %p6217_p12 }
 0xff3   : > { %p6215_p10 = pneg %p6214_p9 }
 0xff4   : > { %p6221_p7 = por %p6220_p4, %p6219_p3 }
 0xff6   : > { %p6222_p8 = pnand %p6221_p7, %p6215_p10 }
 0xff8   : > { %6225 = shalt.err (!%p6222_p8)
}
 0xff9   : > { %5598 = dma.vmem_to_hbm [thread:$0]  (%p7106_p1), %s6927_s23, 256, %s6969_s5, %s4753_s30, %s6290_s22, %s6290_s22, %s6291_s2   ;;  %vm4741_vm8 = vcmask 31744  }
 0xffa   : > { %s7109_s25 = sld [smem:[#allocation32_spill]]  ;;  %s7110_s27 = sld [smem:[#allocation33_spill]] }
0x1000   : > { %v5301_v26 = vld [vmem:[%s7109_s25] ss:$0 sm:$0xff]  ;;  %s746_s26 = scalar_lea.vmem %s7110_s27, %s6536_s0 }
0x10a5   : > { %v5395_v23 = vpop.f32.mrb[36].mxu1 }
0x10a6   : > { %v5417_v24 = vpop.f32.mrb[44].mxu0  ;;  %v5396_v32 = vpop.f32.mrb[37].mxu1 }
0x10a7   : > { %v5397_v38 = vadd.f32 %v5396_v32, %v5395_v23  ;;  %v5418_v33 = vpop.f32.mrb[45].mxu0  ;;  %v5398_v56 = vpop.f32.mrb[38].mxu1 }
0x10a8   : > { %v5419_v34 = vadd.f32 %v5418_v33, %v5417_v24  ;;  %v5420_v36 = vpop.f32.mrb[46].mxu0  ;;  %v5399_v60 = vpop.f32.mrb[39].mxu1 }
0x10a9   : > { %v4696_v37 = vadd.f32 %v5397_v38, %v5301_v26  ;;  %v5421_v29 = vpop.f32.mrb[47].mxu0 }
0x10ab   : > { %v4736_v39 = vadd.f32 %v5419_v34, %v4696_v37 }
0x10ad   : > { %4742 = vst.msk [vmem:[%s746_s26] sm:$0xff] %vm4741_vm8, %v4736_v39 }
0x10ae PF: > { %s7111_s23 = sld [smem:[#allocation17_spill]]  ;;  %s7112_s22 = sld [smem:[#allocation15_spill]] }
0x10af   : > { %s7113_s2 = sld [smem:[#allocation20_spill]] }
0x10b4   : > { %p5619_p1 = scmp.ge.s32.totalorder %s7111_s23, 2  ;;  %s4807_s5 = sand.u32 1, %s7112_s22  }
0x10b5   : > { %p7114_p11 = scmp.ne.s32.totalorder %s7113_s2, 0  ;;  %s4808_s30 = scalar_lea.sflag [#allocation5], %s4807_s5 }
0x10b7   : > { %p5609_p13 = pnand %p5619_p1, %p7114_p11 }
0x10b9   : > { %6251 = dma.done.wait (!%p5609_p13), %s4808_s30, 256  }
0x10ba   : > { %6253 = vsyncadd (!%p5609_p13), %s4808_s30, 4294967040  ;;  %s4817_s4 = scalar_lea.sflag [#allocation10], %s4807_s5 }
0x10bb   : > { %6255 = dma.done.wait (!%p5609_p13), %s4817_s4, 256  }
0x10bc   : > { %6257 = vsyncadd (!%p5609_p13), %s4817_s4, 4294967040  ;;  %s7115_s30 = sld [smem:[#allocation18_spill]]  ;;  %s7116_s0 = sld [smem:[#allocation16_spill]] }
0x10bd   : > { %s7117_s29 = sld [smem:[#allocation19_spill]]  ;;  %s7118_s3 = smov %s6264_s28 }
0x10c2   : > { %p38_p0 = scmp.ge.s32.totalorder %s7115_s30, 4   ;;  %s7119_s28 = smov %s7116_s0 }
0x10c4   :  { %40 = sbr.rel (!%p38_p0) target bundleno = 22 (0x16), region = 178 }
0x10cb   :  { %4822 = vsyncpa [#allocation4], 1 }
0x10cc   :  { %4824 = vsyncpa [#allocation4 + $0x1], 1 }
0x10cd   :  { %4825 = vsyncpa [#allocation7], 1 }
0x10ce   :  { %4826 = vsyncpa [#allocation5], 1 }
0x10cf   :  { %4828 = vsyncpa [#allocation5 + $0x1], 1 }
0x10d0   :  { %4829 = vsyncpa [#allocation10], 1 }
0x10d1   :  { %4831 = vsyncpa [#allocation10 + $0x1], 1 }

</bundles_post_ra>
